<compile_context>
chip_gen: v5e
topology: v5e:2x2
jax: 0.10.0
libtpu: 0.0.40
codegen_flags: <defaults>
</compile_context>

<pallas_src>
import functools
import math

import jax
import jax.numpy as jnp
from jax.experimental import pallas as pl
from jax.experimental.pallas import tpu as pltpu

LN_EPS = 1e-5
MATMUL_DTYPE = jnp.bfloat16   # set to jnp.float32 for exact-fp32 reference parity


def _layernorm(x, gamma, beta):
    mu = jnp.mean(x, axis=-1, keepdims=True)
    var = jnp.mean(jnp.square(x - mu), axis=-1, keepdims=True)
    return (x - mu) * jax.lax.rsqrt(var + LN_EPS) * gamma + beta


# ---------------- fused per-layer kernel ----------------
def layer_kernel(x_ref,
                 attn_g_ref, attn_b_ref, wqkv_ref, wout_ref,
                 ff_g_ref, ff_b_ref, w1_ref, b1_ref, w2_ref, b2_ref,
                 out_g_ref, out_b_ref,
                 o_ref,
                 *, heads, dim_head, apply_final_ln):
    bt, n, dim = x_ref.shape
    inner = heads * dim_head
    rows = bt * n
    mm = wqkv_ref.dtype                      # matmul operand dtype (bf16 / f32)

    # flatten (bt, n, dim) -> (bt*n, dim) so LN / linears see denser sublanes.
    x = x_ref[...].reshape(rows, dim)        # float32 activations

    # ---------------- attention half (pre-LN) ----------------
    xn = _layernorm(x, attn_g_ref[0], attn_b_ref[0])
    qkv = jnp.dot(xn.astype(mm), wqkv_ref[...],
                  preferred_element_type=jnp.float32)        # (rows, 3*inner) f32

    def stack_heads(sel):
        # gather per-(sequence, head) blocks into a leading-batch layout
        # (bt*heads, n, dim_head) without any in-kernel transpose.
        parts = []
        for b_i in range(bt):
            r0 = b_i * n
            for h in range(heads):
                c0 = sel * inner + h * dim_head
                parts.append(qkv[r0:r0 + n, c0:c0 + dim_head])
        return jnp.stack(parts, axis=0)

    q = stack_heads(0)
    k = stack_heads(1)
    v = stack_heads(2)

    # scale already folded into the Q columns of wqkv.
    dots = jnp.einsum('hqd,hkd->hqk', q.astype(mm), k.astype(mm),
                      preferred_element_type=jnp.float32)    # (bt*heads, n, n)
    m = jnp.max(dots, axis=-1, keepdims=True)                # f32 softmax stats
    e = jnp.exp(dots - m)
    attn = e * pl.reciprocal(jnp.sum(e, axis=-1, keepdims=True), approx=True)
    ctx = jnp.einsum('hqk,hkd->hqd', attn.astype(mm), v.astype(mm),
                     preferred_element_type=jnp.float32)     # (bt*heads, n, dh)

    # re-pack heads onto the lane axis -> (rows, inner), one dense out-proj.
    ctx_rows = [jnp.concatenate([ctx[b_i * heads + h] for h in range(heads)],
                                axis=-1) for b_i in range(bt)]
    ctx2 = ctx_rows[0] if bt == 1 else jnp.concatenate(ctx_rows, axis=0)
    proj = jnp.dot(ctx2.astype(mm), wout_ref[...],
                   preferred_element_type=jnp.float32)       # (rows, dim)
    x = x + proj                                             # residual 1

    # ---------------- feed-forward half (pre-LN) ----------------
    xn2 = _layernorm(x, ff_g_ref[0], ff_b_ref[0])
    h1 = jnp.dot(xn2.astype(mm), w1_ref[...],
                 preferred_element_type=jnp.float32) + b1_ref[0]
    # exact (erf-based) GELU, matching nn.GELU() default, in float32.
    h1 = 0.5 * h1 * (1.0 + jax.lax.erf(h1 * (1.0 / math.sqrt(2.0))))
    h2 = jnp.dot(h1.astype(mm), w2_ref[...],
                 preferred_element_type=jnp.float32) + b2_ref[0]
    x = x + h2                                               # residual 2

    if apply_final_ln:                                       # fused final LN
        x = _layernorm(x, out_g_ref[0], out_b_ref[0])

    o_ref[...] = x.reshape(bt, n, dim)


# ---------------- wrappers ----------------
def _replicated_spec(arr):
    nd = arr.ndim
    return pl.BlockSpec(arr.shape, lambda i: (0,) * nd)


def _layer_cost(b, n, dim, heads, dim_head, mlp_dim, args, out_nbytes):
    inner = heads * dim_head
    rows = b * n
    flops = (2 * rows * dim * 3 * inner          # qkv projection
             + 2 * b * heads * n * n * dim_head  # q @ k^T
             + 2 * b * heads * n * n * dim_head  # attn @ v
             + 2 * rows * inner * dim            # output projection
             + 2 * rows * dim * mlp_dim          # mlp up
             + 2 * rows * mlp_dim * dim)         # mlp down
    transcendentals = (b * heads * n * n         # exp
                       + rows * mlp_dim          # erf
                       + b * heads * n           # reciprocal
                       + 3 * rows)               # rsqrt (layernorms)
    bytes_accessed = int(out_nbytes +
                         sum(int(a.size) * a.dtype.itemsize for a in args))
    return pl.CostEstimate(flops=int(flops),
                           transcendentals=int(transcendentals),
                           bytes_accessed=bytes_accessed)


def transformer_layer(x, p, final_gamma, final_beta, *, heads, dim_head,
                      apply_final_ln, batch_block=1):
    b, n, dim = x.shape
    assert b % batch_block == 0
    mlp_dim = p["w1"].shape[1]

    args = (x, p["attn_gamma"], p["attn_beta"], p["wqkv"], p["wout"],
            p["ff_gamma"], p["ff_beta"], p["w1"], p["b1"], p["w2"], p["b2"],
            final_gamma, final_beta)

    io_spec = pl.BlockSpec((batch_block, n, dim), lambda i: (i, 0, 0))
    in_specs = [io_spec] + [_replicated_spec(a) for a in args[1:]]

    kernel = functools.partial(layer_kernel, heads=heads, dim_head=dim_head,
                               apply_final_ln=apply_final_ln)
    cost = _layer_cost(b, n, dim, heads, dim_head, mlp_dim, args,
                       out_nbytes=b * n * dim * 4)

    return pl.pallas_call(
        kernel,
        out_shape=jax.ShapeDtypeStruct((b, n, dim), jnp.float32),
        grid=(b // batch_block,),
        in_specs=in_specs,
        out_specs=io_spec,
        compiler_params=pltpu.CompilerParams(
            dimension_semantics=("parallel",)),
        cost_estimate=cost,
    )(*args)


def transformer_forward(x, layers, final, *, heads, dim_head, batch_block=1):
    assert len(layers) >= 1, "depth must be >= 1"
    last = len(layers) - 1
    for idx, p in enumerate(layers):
        x = transformer_layer(x, p, final["gamma"], final["beta"],
                              heads=heads, dim_head=dim_head,
                              apply_final_ln=(idx == last),
                              batch_block=batch_block)
    return x


def init_params(key, dim, depth, heads, dim_head, mlp_dim):
    inner = heads * dim_head
    scale = dim_head ** (-0.5)
    layers = []
    for _ in range(depth):
        keys = jax.random.split(key, 9)
        key = keys[0]
        wqkv = 0.05 * jax.random.normal(keys[3], (dim, 3 * inner), jnp.float32)
        # fold the attention scale into the Q columns: (xW_q)*s @ k^T == (q@k^T)*s
        wqkv = wqkv.at[:, :inner].multiply(scale)
        layer = dict(
            attn_gamma=1.0 + 0.02 * jax.random.normal(keys[1], (1, dim), jnp.float32),
            attn_beta=0.02 * jax.random.normal(keys[2], (1, dim), jnp.float32),
            wqkv=wqkv.astype(MATMUL_DTYPE),
            wout=(0.05 * jax.random.normal(keys[4], (inner, dim), jnp.float32)
                  ).astype(MATMUL_DTYPE),
            ff_gamma=1.0 + 0.02 * jax.random.normal(keys[5], (1, dim), jnp.float32),
            ff_beta=0.02 * jax.random.normal(keys[6], (1, dim), jnp.float32),
            w1=(0.05 * jax.random.normal(keys[7], (dim, mlp_dim), jnp.float32)
                ).astype(MATMUL_DTYPE),
            b1=jnp.zeros((1, mlp_dim), jnp.float32),
            w2=(0.05 * jax.random.normal(keys[8], (mlp_dim, dim), jnp.float32)
                ).astype(MATMUL_DTYPE),
            b2=jnp.zeros((1, dim), jnp.float32),
        )
        layers.append(layer)
    kf1, kf2 = jax.random.split(key)
    final = dict(
        gamma=1.0 + 0.02 * jax.random.normal(kf1, (1, dim), jnp.float32),
        beta=0.02 * jax.random.normal(kf2, (1, dim), jnp.float32),
    )
    return layers, final


if __name__ == "__main__":
    # small shapes consistent with Transformer(dim, depth, heads, dim_head, mlp_dim)
    batch, seq, dim = 2, 8, 32
    depth, heads, dim_head, mlp_dim = 2, 4, 8, 64

    key = jax.random.PRNGKey(0)
    kx, kp = jax.random.split(key)
    x = jax.random.normal(kx, (batch, seq, dim), jnp.float32)
    layers, final = init_params(kp, dim, depth, heads, dim_head, mlp_dim)

    fwd = jax.jit(functools.partial(transformer_forward, heads=heads,
                                    dim_head=dim_head, batch_block=1))
    out = jax.block_until_ready(fwd(x, layers, final))

    assert out.shape == (batch, seq, dim)
    assert bool(jnp.all(jnp.isfinite(out)))
    print("KERNEL_OK")
</pallas_src>

<mosaic_0001>
module attributes {stable_mosaic.version = 11 : i64} {
  func.func @layer_kernel(%arg0: i32, %arg1: memref<1x8x32xf32, #tpu.memory_space<vmem>>, %arg2: memref<1x32xf32, #tpu.memory_space<vmem>>, %arg3: memref<1x32xf32, #tpu.memory_space<vmem>>, %arg4: memref<32x96xbf16, #tpu.memory_space<vmem>>, %arg5: memref<32x32xbf16, #tpu.memory_space<vmem>>, %arg6: memref<1x32xf32, #tpu.memory_space<vmem>>, %arg7: memref<1x32xf32, #tpu.memory_space<vmem>>, %arg8: memref<32x64xbf16, #tpu.memory_space<vmem>>, %arg9: memref<1x64xf32, #tpu.memory_space<vmem>>, %arg10: memref<64x32xbf16, #tpu.memory_space<vmem>>, %arg11: memref<1x32xf32, #tpu.memory_space<vmem>>, %arg12: memref<1x32xf32, #tpu.memory_space<vmem>>, %arg13: memref<1x32xf32, #tpu.memory_space<vmem>>, %arg14: memref<1x8x32xf32, #tpu.memory_space<vmem>>) attributes {dimension_semantics = [#tpu.dimension_semantics<parallel>], iteration_bounds = array<i64: 2>, scalar_prefetch = 0 : i64, scratch_operands = 0 : i64, tpu.core_type = #tpu.core_type<tc>, window_params = [{transform_indices = @transform_0, window_bounds = array<i64: 1, 8, 32>}, {pipeline_mode = #tpu.pipeline_mode<synchronous>, transform_indices = @transform_1, window_bounds = array<i64: 1, 32>}, {pipeline_mode = #tpu.pipeline_mode<synchronous>, transform_indices = @transform_2, window_bounds = array<i64: 1, 32>}, {pipeline_mode = #tpu.pipeline_mode<synchronous>, transform_indices = @transform_3, window_bounds = array<i64: 32, 96>}, {pipeline_mode = #tpu.pipeline_mode<synchronous>, transform_indices = @transform_4, window_bounds = array<i64: 32, 32>}, {pipeline_mode = #tpu.pipeline_mode<synchronous>, transform_indices = @transform_5, window_bounds = array<i64: 1, 32>}, {pipeline_mode = #tpu.pipeline_mode<synchronous>, transform_indices = @transform_6, window_bounds = array<i64: 1, 32>}, {pipeline_mode = #tpu.pipeline_mode<synchronous>, transform_indices = @transform_7, window_bounds = array<i64: 32, 64>}, {pipeline_mode = #tpu.pipeline_mode<synchronous>, transform_indices = @transform_8, window_bounds = array<i64: 1, 64>}, {pipeline_mode = #tpu.pipeline_mode<synchronous>, transform_indices = @transform_9, window_bounds = array<i64: 64, 32>}, {pipeline_mode = #tpu.pipeline_mode<synchronous>, transform_indices = @transform_10, window_bounds = array<i64: 1, 32>}, {pipeline_mode = #tpu.pipeline_mode<synchronous>, transform_indices = @transform_11, window_bounds = array<i64: 1, 32>}, {pipeline_mode = #tpu.pipeline_mode<synchronous>, transform_indices = @transform_12, window_bounds = array<i64: 1, 32>}, {transform_indices = @transform_13, window_bounds = array<i64: 1, 8, 32>}]} {
    %c0 = arith.constant 0 : index
    %c0_0 = arith.constant 0 : index
    %c0_1 = arith.constant 0 : index
    %0 = vector.load %arg1[%c0, %c0_0, %c0_1] : memref<1x8x32xf32, #tpu.memory_space<vmem>>, vector<1x8x32xf32>
    %1 = vector.shape_cast %0 : vector<1x8x32xf32> to vector<8x32xf32>
    %c0_2 = arith.constant 0 : index
    %c0_3 = arith.constant 0 : index
    %2 = vector.load %arg2[%c0_2, %c0_3] : memref<1x32xf32, #tpu.memory_space<vmem>>, vector<1x32xf32>
    %3 = vector.shape_cast %2 : vector<1x32xf32> to vector<32xf32>
    %c0_4 = arith.constant 0 : index
    %c0_5 = arith.constant 0 : index
    %4 = vector.load %arg3[%c0_4, %c0_5] : memref<1x32xf32, #tpu.memory_space<vmem>>, vector<1x32xf32>
    %5 = vector.shape_cast %4 : vector<1x32xf32> to vector<32xf32>
    %cst = arith.constant dense<0.000000e+00> : vector<8xf32>
    %6 = vector.multi_reduction <add>, %1, %cst [1] : vector<8x32xf32> to vector<8xf32>
    %7 = vector.shape_cast %6 : vector<8xf32> to vector<8x1xf32>
    %cst_6 = arith.constant 3.200000e+01 : f32
    %8 = vector.broadcast %cst_6 : f32 to vector<8x1xf32>
    %9 = arith.divf %7, %8 : vector<8x1xf32>
    %10 = vector.broadcast %9 : vector<8x1xf32> to vector<8x32xf32>
    %11 = arith.subf %1, %10 : vector<8x32xf32>
    %12 = arith.mulf %11, %11 : vector<8x32xf32>
    %cst_7 = arith.constant dense<0.000000e+00> : vector<8xf32>
    %13 = vector.multi_reduction <add>, %12, %cst_7 [1] : vector<8x32xf32> to vector<8xf32>
    %14 = vector.shape_cast %13 : vector<8xf32> to vector<8x1xf32>
    %cst_8 = arith.constant 3.200000e+01 : f32
    %15 = vector.broadcast %cst_8 : f32 to vector<8x1xf32>
    %16 = arith.divf %14, %15 : vector<8x1xf32>
    %17 = vector.broadcast %9 : vector<8x1xf32> to vector<8x32xf32>
    %18 = arith.subf %1, %17 : vector<8x32xf32>
    %cst_9 = arith.constant 9.99999974E-6 : f32
    %19 = vector.broadcast %cst_9 : f32 to vector<8x1xf32>
    %20 = arith.addf %16, %19 : vector<8x1xf32>
    %21 = math.rsqrt %20 : vector<8x1xf32>
    %22 = vector.broadcast %21 : vector<8x1xf32> to vector<8x32xf32>
    %23 = arith.mulf %18, %22 : vector<8x32xf32>
    %24 = vector.shape_cast %3 : vector<32xf32> to vector<1x32xf32>
    %25 = vector.broadcast %24 : vector<1x32xf32> to vector<8x32xf32>
    %26 = arith.mulf %23, %25 : vector<8x32xf32>
    %27 = vector.shape_cast %5 : vector<32xf32> to vector<1x32xf32>
    %28 = vector.broadcast %27 : vector<1x32xf32> to vector<8x32xf32>
    %29 = arith.addf %26, %28 : vector<8x32xf32>
    %30 = arith.truncf %29 : vector<8x32xf32> to vector<8x32xbf16>
    %c0_10 = arith.constant 0 : index
    %c0_11 = arith.constant 0 : index
    %31 = vector.load %arg4[%c0_10, %c0_11] : memref<32x96xbf16, #tpu.memory_space<vmem>>, vector<32x96xbf16>
    %cst_12 = arith.constant dense<0.000000e+00> : vector<8x96xf32>
    %32 = tpu.matmul %30, %31, %cst_12 {dimension_numbers = #tpu.dot_dimension_numbers<[1], [0], [0], [1], [0, 0, 1, 1], [], []>} : vector<8x32xbf16>, vector<32x96xbf16>, vector<8x96xf32> -> vector<8x96xf32>
    %33 = vector.extract_strided_slice %32 {offsets = [0, 0], sizes = [8, 8], strides = [1, 1]} : vector<8x96xf32> to vector<8x8xf32>
    %34 = vector.extract_strided_slice %32 {offsets = [0, 8], sizes = [8, 8], strides = [1, 1]} : vector<8x96xf32> to vector<8x8xf32>
    %35 = vector.extract_strided_slice %32 {offsets = [0, 16], sizes = [8, 8], strides = [1, 1]} : vector<8x96xf32> to vector<8x8xf32>
    %36 = vector.extract_strided_slice %32 {offsets = [0, 24], sizes = [8, 8], strides = [1, 1]} : vector<8x96xf32> to vector<8x8xf32>
    %37 = vector.shape_cast %33 : vector<8x8xf32> to vector<1x8x8xf32>
    %38 = vector.shape_cast %34 : vector<8x8xf32> to vector<1x8x8xf32>
    %39 = vector.shape_cast %35 : vector<8x8xf32> to vector<1x8x8xf32>
    %40 = vector.shape_cast %36 : vector<8x8xf32> to vector<1x8x8xf32>
    %41 = tpu.concatenate %37, %38, %39, %40 in 0 : vector<1x8x8xf32>, vector<1x8x8xf32>, vector<1x8x8xf32>, vector<1x8x8xf32> -> vector<4x8x8xf32>
    %42 = vector.extract_strided_slice %32 {offsets = [0, 32], sizes = [8, 8], strides = [1, 1]} : vector<8x96xf32> to vector<8x8xf32>
    %43 = vector.extract_strided_slice %32 {offsets = [0, 40], sizes = [8, 8], strides = [1, 1]} : vector<8x96xf32> to vector<8x8xf32>
    %44 = vector.extract_strided_slice %32 {offsets = [0, 48], sizes = [8, 8], strides = [1, 1]} : vector<8x96xf32> to vector<8x8xf32>
    %45 = vector.extract_strided_slice %32 {offsets = [0, 56], sizes = [8, 8], strides = [1, 1]} : vector<8x96xf32> to vector<8x8xf32>
    %46 = vector.shape_cast %42 : vector<8x8xf32> to vector<1x8x8xf32>
    %47 = vector.shape_cast %43 : vector<8x8xf32> to vector<1x8x8xf32>
    %48 = vector.shape_cast %44 : vector<8x8xf32> to vector<1x8x8xf32>
    %49 = vector.shape_cast %45 : vector<8x8xf32> to vector<1x8x8xf32>
    %50 = tpu.concatenate %46, %47, %48, %49 in 0 : vector<1x8x8xf32>, vector<1x8x8xf32>, vector<1x8x8xf32>, vector<1x8x8xf32> -> vector<4x8x8xf32>
    %51 = vector.extract_strided_slice %32 {offsets = [0, 64], sizes = [8, 8], strides = [1, 1]} : vector<8x96xf32> to vector<8x8xf32>
    %52 = vector.extract_strided_slice %32 {offsets = [0, 72], sizes = [8, 8], strides = [1, 1]} : vector<8x96xf32> to vector<8x8xf32>
    %53 = vector.extract_strided_slice %32 {offsets = [0, 80], sizes = [8, 8], strides = [1, 1]} : vector<8x96xf32> to vector<8x8xf32>
    %54 = vector.extract_strided_slice %32 {offsets = [0, 88], sizes = [8, 8], strides = [1, 1]} : vector<8x96xf32> to vector<8x8xf32>
    %55 = vector.shape_cast %51 : vector<8x8xf32> to vector<1x8x8xf32>
    %56 = vector.shape_cast %52 : vector<8x8xf32> to vector<1x8x8xf32>
    %57 = vector.shape_cast %53 : vector<8x8xf32> to vector<1x8x8xf32>
    %58 = vector.shape_cast %54 : vector<8x8xf32> to vector<1x8x8xf32>
    %59 = tpu.concatenate %55, %56, %57, %58 in 0 : vector<1x8x8xf32>, vector<1x8x8xf32>, vector<1x8x8xf32>, vector<1x8x8xf32> -> vector<4x8x8xf32>
    %60 = arith.truncf %41 : vector<4x8x8xf32> to vector<4x8x8xbf16>
    %61 = arith.truncf %50 : vector<4x8x8xf32> to vector<4x8x8xbf16>
    "tpu.trace_start"() <{level = 10 : i32, message = "hqd,hkd->hqk"}> : () -> ()
    %cst_13 = arith.constant dense<0.000000e+00> : vector<4x8x8xf32>
    %62 = tpu.matmul %60, %61, %cst_13 {dimension_numbers = #tpu.dot_dimension_numbers<[2], [2], [1], [1], [0, 0, 0, 1, 1, 1], [0], [0]>} : vector<4x8x8xbf16>, vector<4x8x8xbf16>, vector<4x8x8xf32> -> vector<4x8x8xf32>
    "tpu.trace_stop"() : () -> ()
    %cst_14 = arith.constant dense<0xFF800000> : vector<4x8xf32>
    %63 = vector.multi_reduction <maximumf>, %62, %cst_14 [2] : vector<4x8x8xf32> to vector<4x8xf32>
    %64 = vector.shape_cast %63 : vector<4x8xf32> to vector<4x8x1xf32>
    %65 = vector.broadcast %64 : vector<4x8x1xf32> to vector<4x8x8xf32>
    %66 = arith.subf %62, %65 : vector<4x8x8xf32>
    %67 = math.exp %66 : vector<4x8x8xf32>
    %cst_15 = arith.constant dense<0.000000e+00> : vector<4x8xf32>
    %68 = vector.multi_reduction <add>, %67, %cst_15 [2] : vector<4x8x8xf32> to vector<4x8xf32>
    %69 = vector.shape_cast %68 : vector<4x8xf32> to vector<4x8x1xf32>
    %70 = tpu.reciprocal %69 {approx = true} : vector<4x8x1xf32> -> vector<4x8x1xf32>
    %71 = vector.broadcast %70 : vector<4x8x1xf32> to vector<4x8x8xf32>
    %72 = arith.mulf %67, %71 : vector<4x8x8xf32>
    %73 = arith.truncf %72 : vector<4x8x8xf32> to vector<4x8x8xbf16>
    %74 = arith.truncf %59 : vector<4x8x8xf32> to vector<4x8x8xbf16>
    "tpu.trace_start"() <{level = 10 : i32, message = "hqk,hkd->hqd"}> : () -> ()
    %cst_16 = arith.constant dense<0.000000e+00> : vector<4x8x8xf32>
    %75 = tpu.matmul %73, %74, %cst_16 {dimension_numbers = #tpu.dot_dimension_numbers<[2], [1], [1], [2], [0, 0, 0, 1, 1, 2], [0], [0]>} : vector<4x8x8xbf16>, vector<4x8x8xbf16>, vector<4x8x8xf32> -> vector<4x8x8xf32>
    "tpu.trace_stop"() : () -> ()
    %76 = vector.extract_strided_slice %75 {offsets = [0, 0, 0], sizes = [1, 8, 8], strides = [1, 1, 1]} : vector<4x8x8xf32> to vector<1x8x8xf32>
    %77 = vector.shape_cast %76 : vector<1x8x8xf32> to vector<8x8xf32>
    %78 = vector.extract_strided_slice %75 {offsets = [1, 0, 0], sizes = [1, 8, 8], strides = [1, 1, 1]} : vector<4x8x8xf32> to vector<1x8x8xf32>
    %79 = vector.shape_cast %78 : vector<1x8x8xf32> to vector<8x8xf32>
    %80 = vector.extract_strided_slice %75 {offsets = [2, 0, 0], sizes = [1, 8, 8], strides = [1, 1, 1]} : vector<4x8x8xf32> to vector<1x8x8xf32>
    %81 = vector.shape_cast %80 : vector<1x8x8xf32> to vector<8x8xf32>
    %82 = vector.extract_strided_slice %75 {offsets = [3, 0, 0], sizes = [1, 8, 8], strides = [1, 1, 1]} : vector<4x8x8xf32> to vector<1x8x8xf32>
    %83 = vector.shape_cast %82 : vector<1x8x8xf32> to vector<8x8xf32>
    %84 = tpu.concatenate %77, %79, %81, %83 in 1 : vector<8x8xf32>, vector<8x8xf32>, vector<8x8xf32>, vector<8x8xf32> -> vector<8x32xf32>
    %85 = arith.truncf %84 : vector<8x32xf32> to vector<8x32xbf16>
    %c0_17 = arith.constant 0 : index
    %c0_18 = arith.constant 0 : index
    %86 = vector.load %arg5[%c0_17, %c0_18] : memref<32x32xbf16, #tpu.memory_space<vmem>>, vector<32x32xbf16>
    %cst_19 = arith.constant dense<0.000000e+00> : vector<8x32xf32>
    %87 = tpu.matmul %85, %86, %cst_19 {dimension_numbers = #tpu.dot_dimension_numbers<[1], [0], [0], [1], [0, 0, 1, 1], [], []>} : vector<8x32xbf16>, vector<32x32xbf16>, vector<8x32xf32> -> vector<8x32xf32>
    %88 = arith.addf %1, %87 : vector<8x32xf32>
    %c0_20 = arith.constant 0 : index
    %c0_21 = arith.constant 0 : index
    %89 = vector.load %arg6[%c0_20, %c0_21] : memref<1x32xf32, #tpu.memory_space<vmem>>, vector<1x32xf32>
    %90 = vector.shape_cast %89 : vector<1x32xf32> to vector<32xf32>
    %c0_22 = arith.constant 0 : index
    %c0_23 = arith.constant 0 : index
    %91 = vector.load %arg7[%c0_22, %c0_23] : memref<1x32xf32, #tpu.memory_space<vmem>>, vector<1x32xf32>
    %92 = vector.shape_cast %91 : vector<1x32xf32> to vector<32xf32>
    %cst_24 = arith.constant dense<0.000000e+00> : vector<8xf32>
    %93 = vector.multi_reduction <add>, %88, %cst_24 [1] : vector<8x32xf32> to vector<8xf32>
    %94 = vector.shape_cast %93 : vector<8xf32> to vector<8x1xf32>
    %cst_25 = arith.constant 3.200000e+01 : f32
    %95 = vector.broadcast %cst_25 : f32 to vector<8x1xf32>
    %96 = arith.divf %94, %95 : vector<8x1xf32>
    %97 = vector.broadcast %96 : vector<8x1xf32> to vector<8x32xf32>
    %98 = arith.subf %88, %97 : vector<8x32xf32>
    %99 = arith.mulf %98, %98 : vector<8x32xf32>
    %cst_26 = arith.constant dense<0.000000e+00> : vector<8xf32>
    %100 = vector.multi_reduction <add>, %99, %cst_26 [1] : vector<8x32xf32> to vector<8xf32>
    %101 = vector.shape_cast %100 : vector<8xf32> to vector<8x1xf32>
    %cst_27 = arith.constant 3.200000e+01 : f32
    %102 = vector.broadcast %cst_27 : f32 to vector<8x1xf32>
    %103 = arith.divf %101, %102 : vector<8x1xf32>
    %104 = vector.broadcast %96 : vector<8x1xf32> to vector<8x32xf32>
    %105 = arith.subf %88, %104 : vector<8x32xf32>
    %cst_28 = arith.constant 9.99999974E-6 : f32
    %106 = vector.broadcast %cst_28 : f32 to vector<8x1xf32>
    %107 = arith.addf %103, %106 : vector<8x1xf32>
    %108 = math.rsqrt %107 : vector<8x1xf32>
    %109 = vector.broadcast %108 : vector<8x1xf32> to vector<8x32xf32>
    %110 = arith.mulf %105, %109 : vector<8x32xf32>
    %111 = vector.shape_cast %90 : vector<32xf32> to vector<1x32xf32>
    %112 = vector.broadcast %111 : vector<1x32xf32> to vector<8x32xf32>
    %113 = arith.mulf %110, %112 : vector<8x32xf32>
    %114 = vector.shape_cast %92 : vector<32xf32> to vector<1x32xf32>
    %115 = vector.broadcast %114 : vector<1x32xf32> to vector<8x32xf32>
    %116 = arith.addf %113, %115 : vector<8x32xf32>
    %117 = arith.truncf %116 : vector<8x32xf32> to vector<8x32xbf16>
    %c0_29 = arith.constant 0 : index
    %c0_30 = arith.constant 0 : index
    %118 = vector.load %arg8[%c0_29, %c0_30] : memref<32x64xbf16, #tpu.memory_space<vmem>>, vector<32x64xbf16>
    %cst_31 = arith.constant dense<0.000000e+00> : vector<8x64xf32>
    %119 = tpu.matmul %117, %118, %cst_31 {dimension_numbers = #tpu.dot_dimension_numbers<[1], [0], [0], [1], [0, 0, 1, 1], [], []>} : vector<8x32xbf16>, vector<32x64xbf16>, vector<8x64xf32> -> vector<8x64xf32>
    %c0_32 = arith.constant 0 : index
    %c0_33 = arith.constant 0 : index
    %120 = vector.load %arg9[%c0_32, %c0_33] : memref<1x64xf32, #tpu.memory_space<vmem>>, vector<1x64xf32>
    %121 = vector.shape_cast %120 : vector<1x64xf32> to vector<64xf32>
    %122 = vector.shape_cast %121 : vector<64xf32> to vector<1x64xf32>
    %123 = vector.broadcast %122 : vector<1x64xf32> to vector<8x64xf32>
    %124 = arith.addf %119, %123 : vector<8x64xf32>
    %cst_34 = arith.constant 5.000000e-01 : f32
    %125 = vector.broadcast %cst_34 : f32 to vector<8x64xf32>
    %126 = arith.mulf %125, %124 : vector<8x64xf32>
    %cst_35 = arith.constant 0.707106769 : f32
    %127 = vector.broadcast %cst_35 : f32 to vector<8x64xf32>
    %128 = arith.mulf %124, %127 : vector<8x64xf32>
    %129 = math.erf %128 : vector<8x64xf32>
    %cst_36 = arith.constant 1.000000e+00 : f32
    %130 = vector.broadcast %cst_36 : f32 to vector<8x64xf32>
    %131 = arith.addf %130, %129 : vector<8x64xf32>
    %132 = arith.mulf %126, %131 : vector<8x64xf32>
    %133 = arith.truncf %132 : vector<8x64xf32> to vector<8x64xbf16>
    %c0_37 = arith.constant 0 : index
    %c0_38 = arith.constant 0 : index
    %134 = vector.load %arg10[%c0_37, %c0_38] : memref<64x32xbf16, #tpu.memory_space<vmem>>, vector<64x32xbf16>
    %cst_39 = arith.constant dense<0.000000e+00> : vector<8x32xf32>
    %135 = tpu.matmul %133, %134, %cst_39 {dimension_numbers = #tpu.dot_dimension_numbers<[1], [0], [0], [1], [0, 0, 1, 1], [], []>} : vector<8x64xbf16>, vector<64x32xbf16>, vector<8x32xf32> -> vector<8x32xf32>
    %c0_40 = arith.constant 0 : index
    %c0_41 = arith.constant 0 : index
    %136 = vector.load %arg11[%c0_40, %c0_41] : memref<1x32xf32, #tpu.memory_space<vmem>>, vector<1x32xf32>
    %137 = vector.shape_cast %136 : vector<1x32xf32> to vector<32xf32>
    %138 = vector.shape_cast %137 : vector<32xf32> to vector<1x32xf32>
    %139 = vector.broadcast %138 : vector<1x32xf32> to vector<8x32xf32>
    %140 = arith.addf %135, %139 : vector<8x32xf32>
    %141 = arith.addf %88, %140 : vector<8x32xf32>
    %142 = vector.shape_cast %141 : vector<8x32xf32> to vector<1x8x32xf32>
    %c0_42 = arith.constant 0 : index
    %c0_43 = arith.constant 0 : index
    %c0_44 = arith.constant 0 : index
    %143 = vector.load %arg14[%c0_42, %c0_43, %c0_44] : memref<1x8x32xf32, #tpu.memory_space<vmem>>, vector<1x8x32xf32>
    tpu.vector_store %arg14[%c0_42, %c0_43, %c0_44], %142 {strides = array<i32>} : memref<1x8x32xf32, #tpu.memory_space<vmem>>, vector<1x8x32xf32>,
    return
  }
  func.func @transform_0(%arg0: i32) -> (i32, i32, i32) {
    %c0_i32 = arith.constant 0 : i32
    %c0_i32_0 = arith.constant 0 : i32
    %c0_i32_1 = arith.constant 0 : i32
    return %arg0, %c0_i32, %c0_i32_0 : i32, i32, i32
  }
  func.func @transform_1(%arg0: i32) -> (i32, i32) {
    %c0_i32 = arith.constant 0 : i32
    %c0_i32_0 = arith.constant 0 : i32
    %c0_i32_1 = arith.constant 0 : i32
    return %c0_i32, %c0_i32_0 : i32, i32
  }
  func.func @transform_2(%arg0: i32) -> (i32, i32) {
    %c0_i32 = arith.constant 0 : i32
    %c0_i32_0 = arith.constant 0 : i32
    %c0_i32_1 = arith.constant 0 : i32
    return %c0_i32, %c0_i32_0 : i32, i32
  }
  func.func @transform_3(%arg0: i32) -> (i32, i32) {
    %c0_i32 = arith.constant 0 : i32
    %c0_i32_0 = arith.constant 0 : i32
    %c0_i32_1 = arith.constant 0 : i32
    return %c0_i32, %c0_i32_0 : i32, i32
  }
  func.func @transform_4(%arg0: i32) -> (i32, i32) {
    %c0_i32 = arith.constant 0 : i32
    %c0_i32_0 = arith.constant 0 : i32
    %c0_i32_1 = arith.constant 0 : i32
    return %c0_i32, %c0_i32_0 : i32, i32
  }
  func.func @transform_5(%arg0: i32) -> (i32, i32) {
    %c0_i32 = arith.constant 0 : i32
    %c0_i32_0 = arith.constant 0 : i32
    %c0_i32_1 = arith.constant 0 : i32
    return %c0_i32, %c0_i32_0 : i32, i32
  }
  func.func @transform_6(%arg0: i32) -> (i32, i32) {
    %c0_i32 = arith.constant 0 : i32
    %c0_i32_0 = arith.constant 0 : i32
    %c0_i32_1 = arith.constant 0 : i32
    return %c0_i32, %c0_i32_0 : i32, i32
  }
  func.func @transform_7(%arg0: i32) -> (i32, i32) {
    %c0_i32 = arith.constant 0 : i32
    %c0_i32_0 = arith.constant 0 : i32
    %c0_i32_1 = arith.constant 0 : i32
    return %c0_i32, %c0_i32_0 : i32, i32
  }
  func.func @transform_8(%arg0: i32) -> (i32, i32) {
    %c0_i32 = arith.constant 0 : i32
    %c0_i32_0 = arith.constant 0 : i32
    %c0_i32_1 = arith.constant 0 : i32
    return %c0_i32, %c0_i32_0 : i32, i32
  }
  func.func @transform_9(%arg0: i32) -> (i32, i32) {
    %c0_i32 = arith.constant 0 : i32
    %c0_i32_0 = arith.constant 0 : i32
    %c0_i32_1 = arith.constant 0 : i32
    return %c0_i32, %c0_i32_0 : i32, i32
  }
  func.func @transform_10(%arg0: i32) -> (i32, i32) {
    %c0_i32 = arith.constant 0 : i32
    %c0_i32_0 = arith.constant 0 : i32
    %c0_i32_1 = arith.constant 0 : i32
    return %c0_i32, %c0_i32_0 : i32, i32
  }
  func.func @transform_11(%arg0: i32) -> (i32, i32) {
    %c0_i32 = arith.constant 0 : i32
    %c0_i32_0 = arith.constant 0 : i32
    %c0_i32_1 = arith.constant 0 : i32
    return %c0_i32, %c0_i32_0 : i32, i32
  }
  func.func @transform_12(%arg0: i32) -> (i32, i32) {
    %c0_i32 = arith.constant 0 : i32
    %c0_i32_0 = arith.constant 0 : i32
    %c0_i32_1 = arith.constant 0 : i32
    return %c0_i32, %c0_i32_0 : i32, i32
  }
  func.func @transform_13(%arg0: i32) -> (i32, i32, i32) {
    %c0_i32 = arith.constant 0 : i32
    %c0_i32_0 = arith.constant 0 : i32
    %c0_i32_1 = arith.constant 0 : i32
    return %arg0, %c0_i32, %c0_i32_0 : i32, i32, i32
  }
}

module attributes {stable_mosaic.version = 11 : i64} {
  func.func @layer_kernel(%arg0: i32, %arg1: memref<1x8x32xf32, #tpu.memory_space<vmem>>, %arg2: memref<1x32xf32, #tpu.memory_space<vmem>>, %arg3: memref<1x32xf32, #tpu.memory_space<vmem>>, %arg4: memref<32x96xbf16, #tpu.memory_space<vmem>>, %arg5: memref<32x32xbf16, #tpu.memory_space<vmem>>, %arg6: memref<1x32xf32, #tpu.memory_space<vmem>>, %arg7: memref<1x32xf32, #tpu.memory_space<vmem>>, %arg8: memref<32x64xbf16, #tpu.memory_space<vmem>>, %arg9: memref<1x64xf32, #tpu.memory_space<vmem>>, %arg10: memref<64x32xbf16, #tpu.memory_space<vmem>>, %arg11: memref<1x32xf32, #tpu.memory_space<vmem>>, %arg12: memref<1x32xf32, #tpu.memory_space<vmem>>, %arg13: memref<1x32xf32, #tpu.memory_space<vmem>>, %arg14: memref<1x8x32xf32, #tpu.memory_space<vmem>>) attributes {dimension_semantics = [#tpu.dimension_semantics<parallel>], iteration_bounds = array<i64: 2>, scalar_prefetch = 0 : i64, scratch_operands = 0 : i64, tpu.core_type = #tpu.core_type<tc>, window_params = [{transform_indices = @transform_0, window_bounds = array<i64: 1, 8, 32>}, {pipeline_mode = #tpu.pipeline_mode<synchronous>, transform_indices = @transform_1, window_bounds = array<i64: 1, 32>}, {pipeline_mode = #tpu.pipeline_mode<synchronous>, transform_indices = @transform_2, window_bounds = array<i64: 1, 32>}, {pipeline_mode = #tpu.pipeline_mode<synchronous>, transform_indices = @transform_3, window_bounds = array<i64: 32, 96>}, {pipeline_mode = #tpu.pipeline_mode<synchronous>, transform_indices = @transform_4, window_bounds = array<i64: 32, 32>}, {pipeline_mode = #tpu.pipeline_mode<synchronous>, transform_indices = @transform_5, window_bounds = array<i64: 1, 32>}, {pipeline_mode = #tpu.pipeline_mode<synchronous>, transform_indices = @transform_6, window_bounds = array<i64: 1, 32>}, {pipeline_mode = #tpu.pipeline_mode<synchronous>, transform_indices = @transform_7, window_bounds = array<i64: 32, 64>}, {pipeline_mode = #tpu.pipeline_mode<synchronous>, transform_indices = @transform_8, window_bounds = array<i64: 1, 64>}, {pipeline_mode = #tpu.pipeline_mode<synchronous>, transform_indices = @transform_9, window_bounds = array<i64: 64, 32>}, {pipeline_mode = #tpu.pipeline_mode<synchronous>, transform_indices = @transform_10, window_bounds = array<i64: 1, 32>}, {pipeline_mode = #tpu.pipeline_mode<synchronous>, transform_indices = @transform_11, window_bounds = array<i64: 1, 32>}, {pipeline_mode = #tpu.pipeline_mode<synchronous>, transform_indices = @transform_12, window_bounds = array<i64: 1, 32>}, {transform_indices = @transform_13, window_bounds = array<i64: 1, 8, 32>}]} {
    %c0 = arith.constant 0 : index
    %c0_0 = arith.constant 0 : index
    %c0_1 = arith.constant 0 : index
    %0 = vector.load %arg1[%c0, %c0_0, %c0_1] : memref<1x8x32xf32, #tpu.memory_space<vmem>>, vector<1x8x32xf32>
    %1 = vector.shape_cast %0 : vector<1x8x32xf32> to vector<8x32xf32>
    %c0_2 = arith.constant 0 : index
    %c0_3 = arith.constant 0 : index
    %2 = vector.load %arg2[%c0_2, %c0_3] : memref<1x32xf32, #tpu.memory_space<vmem>>, vector<1x32xf32>
    %3 = vector.shape_cast %2 : vector<1x32xf32> to vector<32xf32>
    %c0_4 = arith.constant 0 : index
    %c0_5 = arith.constant 0 : index
    %4 = vector.load %arg3[%c0_4, %c0_5] : memref<1x32xf32, #tpu.memory_space<vmem>>, vector<1x32xf32>
    %5 = vector.shape_cast %4 : vector<1x32xf32> to vector<32xf32>
    %cst = arith.constant dense<0.000000e+00> : vector<8xf32>
    %6 = vector.multi_reduction <add>, %1, %cst [1] : vector<8x32xf32> to vector<8xf32>
    %7 = vector.shape_cast %6 : vector<8xf32> to vector<8x1xf32>
    %cst_6 = arith.constant 3.200000e+01 : f32
    %8 = vector.broadcast %cst_6 : f32 to vector<8x1xf32>
    %9 = arith.divf %7, %8 : vector<8x1xf32>
    %10 = vector.broadcast %9 : vector<8x1xf32> to vector<8x32xf32>
    %11 = arith.subf %1, %10 : vector<8x32xf32>
    %12 = arith.mulf %11, %11 : vector<8x32xf32>
    %cst_7 = arith.constant dense<0.000000e+00> : vector<8xf32>
    %13 = vector.multi_reduction <add>, %12, %cst_7 [1] : vector<8x32xf32> to vector<8xf32>
    %14 = vector.shape_cast %13 : vector<8xf32> to vector<8x1xf32>
    %cst_8 = arith.constant 3.200000e+01 : f32
    %15 = vector.broadcast %cst_8 : f32 to vector<8x1xf32>
    %16 = arith.divf %14, %15 : vector<8x1xf32>
    %17 = vector.broadcast %9 : vector<8x1xf32> to vector<8x32xf32>
    %18 = arith.subf %1, %17 : vector<8x32xf32>
    %cst_9 = arith.constant 9.99999974E-6 : f32
    %19 = vector.broadcast %cst_9 : f32 to vector<8x1xf32>
    %20 = arith.addf %16, %19 : vector<8x1xf32>
    %21 = math.rsqrt %20 : vector<8x1xf32>
    %22 = vector.broadcast %21 : vector<8x1xf32> to vector<8x32xf32>
    %23 = arith.mulf %18, %22 : vector<8x32xf32>
    %24 = vector.shape_cast %3 : vector<32xf32> to vector<1x32xf32>
    %25 = vector.broadcast %24 : vector<1x32xf32> to vector<8x32xf32>
    %26 = arith.mulf %23, %25 : vector<8x32xf32>
    %27 = vector.shape_cast %5 : vector<32xf32> to vector<1x32xf32>
    %28 = vector.broadcast %27 : vector<1x32xf32> to vector<8x32xf32>
    %29 = arith.addf %26, %28 : vector<8x32xf32>
    %30 = arith.truncf %29 : vector<8x32xf32> to vector<8x32xbf16>
    %c0_10 = arith.constant 0 : index
    %c0_11 = arith.constant 0 : index
    %31 = vector.load %arg4[%c0_10, %c0_11] : memref<32x96xbf16, #tpu.memory_space<vmem>>, vector<32x96xbf16>
    %cst_12 = arith.constant dense<0.000000e+00> : vector<8x96xf32>
    %32 = tpu.matmul %30, %31, %cst_12 {dimension_numbers = #tpu.dot_dimension_numbers<[1], [0], [0], [1], [0, 0, 1, 1], [], []>} : vector<8x32xbf16>, vector<32x96xbf16>, vector<8x96xf32> -> vector<8x96xf32>
    %33 = vector.extract_strided_slice %32 {offsets = [0, 0], sizes = [8, 8], strides = [1, 1]} : vector<8x96xf32> to vector<8x8xf32>
    %34 = vector.extract_strided_slice %32 {offsets = [0, 8], sizes = [8, 8], strides = [1, 1]} : vector<8x96xf32> to vector<8x8xf32>
    %35 = vector.extract_strided_slice %32 {offsets = [0, 16], sizes = [8, 8], strides = [1, 1]} : vector<8x96xf32> to vector<8x8xf32>
    %36 = vector.extract_strided_slice %32 {offsets = [0, 24], sizes = [8, 8], strides = [1, 1]} : vector<8x96xf32> to vector<8x8xf32>
    %37 = vector.shape_cast %33 : vector<8x8xf32> to vector<1x8x8xf32>
    %38 = vector.shape_cast %34 : vector<8x8xf32> to vector<1x8x8xf32>
    %39 = vector.shape_cast %35 : vector<8x8xf32> to vector<1x8x8xf32>
    %40 = vector.shape_cast %36 : vector<8x8xf32> to vector<1x8x8xf32>
    %41 = tpu.concatenate %37, %38, %39, %40 in 0 : vector<1x8x8xf32>, vector<1x8x8xf32>, vector<1x8x8xf32>, vector<1x8x8xf32> -> vector<4x8x8xf32>
    %42 = vector.extract_strided_slice %32 {offsets = [0, 32], sizes = [8, 8], strides = [1, 1]} : vector<8x96xf32> to vector<8x8xf32>
    %43 = vector.extract_strided_slice %32 {offsets = [0, 40], sizes = [8, 8], strides = [1, 1]} : vector<8x96xf32> to vector<8x8xf32>
    %44 = vector.extract_strided_slice %32 {offsets = [0, 48], sizes = [8, 8], strides = [1, 1]} : vector<8x96xf32> to vector<8x8xf32>
    %45 = vector.extract_strided_slice %32 {offsets = [0, 56], sizes = [8, 8], strides = [1, 1]} : vector<8x96xf32> to vector<8x8xf32>
    %46 = vector.shape_cast %42 : vector<8x8xf32> to vector<1x8x8xf32>
    %47 = vector.shape_cast %43 : vector<8x8xf32> to vector<1x8x8xf32>
    %48 = vector.shape_cast %44 : vector<8x8xf32> to vector<1x8x8xf32>
    %49 = vector.shape_cast %45 : vector<8x8xf32> to vector<1x8x8xf32>
    %50 = tpu.concatenate %46, %47, %48, %49 in 0 : vector<1x8x8xf32>, vector<1x8x8xf32>, vector<1x8x8xf32>, vector<1x8x8xf32> -> vector<4x8x8xf32>
    %51 = vector.extract_strided_slice %32 {offsets = [0, 64], sizes = [8, 8], strides = [1, 1]} : vector<8x96xf32> to vector<8x8xf32>
    %52 = vector.extract_strided_slice %32 {offsets = [0, 72], sizes = [8, 8], strides = [1, 1]} : vector<8x96xf32> to vector<8x8xf32>
    %53 = vector.extract_strided_slice %32 {offsets = [0, 80], sizes = [8, 8], strides = [1, 1]} : vector<8x96xf32> to vector<8x8xf32>
    %54 = vector.extract_strided_slice %32 {offsets = [0, 88], sizes = [8, 8], strides = [1, 1]} : vector<8x96xf32> to vector<8x8xf32>
    %55 = vector.shape_cast %51 : vector<8x8xf32> to vector<1x8x8xf32>
    %56 = vector.shape_cast %52 : vector<8x8xf32> to vector<1x8x8xf32>
    %57 = vector.shape_cast %53 : vector<8x8xf32> to vector<1x8x8xf32>
    %58 = vector.shape_cast %54 : vector<8x8xf32> to vector<1x8x8xf32>
    %59 = tpu.concatenate %55, %56, %57, %58 in 0 : vector<1x8x8xf32>, vector<1x8x8xf32>, vector<1x8x8xf32>, vector<1x8x8xf32> -> vector<4x8x8xf32>
    %60 = arith.truncf %41 : vector<4x8x8xf32> to vector<4x8x8xbf16>
    %61 = arith.truncf %50 : vector<4x8x8xf32> to vector<4x8x8xbf16>
    "tpu.trace_start"() <{level = 10 : i32, message = "hqd,hkd->hqk"}> : () -> ()
    %cst_13 = arith.constant dense<0.000000e+00> : vector<4x8x8xf32>
    %62 = tpu.matmul %60, %61, %cst_13 {dimension_numbers = #tpu.dot_dimension_numbers<[2], [2], [1], [1], [0, 0, 0, 1, 1, 1], [0], [0]>} : vector<4x8x8xbf16>, vector<4x8x8xbf16>, vector<4x8x8xf32> -> vector<4x8x8xf32>
    "tpu.trace_stop"() : () -> ()
    %cst_14 = arith.constant dense<0xFF800000> : vector<4x8xf32>
    %63 = vector.multi_reduction <maximumf>, %62, %cst_14 [2] : vector<4x8x8xf32> to vector<4x8xf32>
    %64 = vector.shape_cast %63 : vector<4x8xf32> to vector<4x8x1xf32>
    %65 = vector.broadcast %64 : vector<4x8x1xf32> to vector<4x8x8xf32>
    %66 = arith.subf %62, %65 : vector<4x8x8xf32>
    %67 = math.exp %66 : vector<4x8x8xf32>
    %cst_15 = arith.constant dense<0.000000e+00> : vector<4x8xf32>
    %68 = vector.multi_reduction <add>, %67, %cst_15 [2] : vector<4x8x8xf32> to vector<4x8xf32>
    %69 = vector.shape_cast %68 : vector<4x8xf32> to vector<4x8x1xf32>
    %70 = tpu.reciprocal %69 {approx = true} : vector<4x8x1xf32> -> vector<4x8x1xf32>
    %71 = vector.broadcast %70 : vector<4x8x1xf32> to vector<4x8x8xf32>
    %72 = arith.mulf %67, %71 : vector<4x8x8xf32>
    %73 = arith.truncf %72 : vector<4x8x8xf32> to vector<4x8x8xbf16>
    %74 = arith.truncf %59 : vector<4x8x8xf32> to vector<4x8x8xbf16>
    "tpu.trace_start"() <{level = 10 : i32, message = "hqk,hkd->hqd"}> : () -> ()
    %cst_16 = arith.constant dense<0.000000e+00> : vector<4x8x8xf32>
    %75 = tpu.matmul %73, %74, %cst_16 {dimension_numbers = #tpu.dot_dimension_numbers<[2], [1], [1], [2], [0, 0, 0, 1, 1, 2], [0], [0]>} : vector<4x8x8xbf16>, vector<4x8x8xbf16>, vector<4x8x8xf32> -> vector<4x8x8xf32>
    "tpu.trace_stop"() : () -> ()
    %76 = vector.extract_strided_slice %75 {offsets = [0, 0, 0], sizes = [1, 8, 8], strides = [1, 1, 1]} : vector<4x8x8xf32> to vector<1x8x8xf32>
    %77 = vector.shape_cast %76 : vector<1x8x8xf32> to vector<8x8xf32>
    %78 = vector.extract_strided_slice %75 {offsets = [1, 0, 0], sizes = [1, 8, 8], strides = [1, 1, 1]} : vector<4x8x8xf32> to vector<1x8x8xf32>
    %79 = vector.shape_cast %78 : vector<1x8x8xf32> to vector<8x8xf32>
    %80 = vector.extract_strided_slice %75 {offsets = [2, 0, 0], sizes = [1, 8, 8], strides = [1, 1, 1]} : vector<4x8x8xf32> to vector<1x8x8xf32>
    %81 = vector.shape_cast %80 : vector<1x8x8xf32> to vector<8x8xf32>
    %82 = vector.extract_strided_slice %75 {offsets = [3, 0, 0], sizes = [1, 8, 8], strides = [1, 1, 1]} : vector<4x8x8xf32> to vector<1x8x8xf32>
    %83 = vector.shape_cast %82 : vector<1x8x8xf32> to vector<8x8xf32>
    %84 = tpu.concatenate %77, %79, %81, %83 in 1 : vector<8x8xf32>, vector<8x8xf32>, vector<8x8xf32>, vector<8x8xf32> -> vector<8x32xf32>
    %85 = arith.truncf %84 : vector<8x32xf32> to vector<8x32xbf16>
    %c0_17 = arith.constant 0 : index
    %c0_18 = arith.constant 0 : index
    %86 = vector.load %arg5[%c0_17, %c0_18] : memref<32x32xbf16, #tpu.memory_space<vmem>>, vector<32x32xbf16>
    %cst_19 = arith.constant dense<0.000000e+00> : vector<8x32xf32>
    %87 = tpu.matmul %85, %86, %cst_19 {dimension_numbers = #tpu.dot_dimension_numbers<[1], [0], [0], [1], [0, 0, 1, 1], [], []>} : vector<8x32xbf16>, vector<32x32xbf16>, vector<8x32xf32> -> vector<8x32xf32>
    %88 = arith.addf %1, %87 : vector<8x32xf32>
    %c0_20 = arith.constant 0 : index
    %c0_21 = arith.constant 0 : index
    %89 = vector.load %arg6[%c0_20, %c0_21] : memref<1x32xf32, #tpu.memory_space<vmem>>, vector<1x32xf32>
    %90 = vector.shape_cast %89 : vector<1x32xf32> to vector<32xf32>
    %c0_22 = arith.constant 0 : index
    %c0_23 = arith.constant 0 : index
    %91 = vector.load %arg7[%c0_22, %c0_23] : memref<1x32xf32, #tpu.memory_space<vmem>>, vector<1x32xf32>
    %92 = vector.shape_cast %91 : vector<1x32xf32> to vector<32xf32>
    %cst_24 = arith.constant dense<0.000000e+00> : vector<8xf32>
    %93 = vector.multi_reduction <add>, %88, %cst_24 [1] : vector<8x32xf32> to vector<8xf32>
    %94 = vector.shape_cast %93 : vector<8xf32> to vector<8x1xf32>
    %cst_25 = arith.constant 3.200000e+01 : f32
    %95 = vector.broadcast %cst_25 : f32 to vector<8x1xf32>
    %96 = arith.divf %94, %95 : vector<8x1xf32>
    %97 = vector.broadcast %96 : vector<8x1xf32> to vector<8x32xf32>
    %98 = arith.subf %88, %97 : vector<8x32xf32>
    %99 = arith.mulf %98, %98 : vector<8x32xf32>
    %cst_26 = arith.constant dense<0.000000e+00> : vector<8xf32>
    %100 = vector.multi_reduction <add>, %99, %cst_26 [1] : vector<8x32xf32> to vector<8xf32>
    %101 = vector.shape_cast %100 : vector<8xf32> to vector<8x1xf32>
    %cst_27 = arith.constant 3.200000e+01 : f32
    %102 = vector.broadcast %cst_27 : f32 to vector<8x1xf32>
    %103 = arith.divf %101, %102 : vector<8x1xf32>
    %104 = vector.broadcast %96 : vector<8x1xf32> to vector<8x32xf32>
    %105 = arith.subf %88, %104 : vector<8x32xf32>
    %cst_28 = arith.constant 9.99999974E-6 : f32
    %106 = vector.broadcast %cst_28 : f32 to vector<8x1xf32>
    %107 = arith.addf %103, %106 : vector<8x1xf32>
    %108 = math.rsqrt %107 : vector<8x1xf32>
    %109 = vector.broadcast %108 : vector<8x1xf32> to vector<8x32xf32>
    %110 = arith.mulf %105, %109 : vector<8x32xf32>
    %111 = vector.shape_cast %90 : vector<32xf32> to vector<1x32xf32>
    %112 = vector.broadcast %111 : vector<1x32xf32> to vector<8x32xf32>
    %113 = arith.mulf %110, %112 : vector<8x32xf32>
    %114 = vector.shape_cast %92 : vector<32xf32> to vector<1x32xf32>
    %115 = vector.broadcast %114 : vector<1x32xf32> to vector<8x32xf32>
    %116 = arith.addf %113, %115 : vector<8x32xf32>
    %117 = arith.truncf %116 : vector<8x32xf32> to vector<8x32xbf16>
    %c0_29 = arith.constant 0 : index
    %c0_30 = arith.constant 0 : index
    %118 = vector.load %arg8[%c0_29, %c0_30] : memref<32x64xbf16, #tpu.memory_space<vmem>>, vector<32x64xbf16>
    %cst_31 = arith.constant dense<0.000000e+00> : vector<8x64xf32>
    %119 = tpu.matmul %117, %118, %cst_31 {dimension_numbers = #tpu.dot_dimension_numbers<[1], [0], [0], [1], [0, 0, 1, 1], [], []>} : vector<8x32xbf16>, vector<32x64xbf16>, vector<8x64xf32> -> vector<8x64xf32>
    %c0_32 = arith.constant 0 : index
    %c0_33 = arith.constant 0 : index
    %120 = vector.load %arg9[%c0_32, %c0_33] : memref<1x64xf32, #tpu.memory_space<vmem>>, vector<1x64xf32>
    %121 = vector.shape_cast %120 : vector<1x64xf32> to vector<64xf32>
    %122 = vector.shape_cast %121 : vector<64xf32> to vector<1x64xf32>
    %123 = vector.broadcast %122 : vector<1x64xf32> to vector<8x64xf32>
    %124 = arith.addf %119, %123 : vector<8x64xf32>
    %cst_34 = arith.constant 5.000000e-01 : f32
    %125 = vector.broadcast %cst_34 : f32 to vector<8x64xf32>
    %126 = arith.mulf %125, %124 : vector<8x64xf32>
    %cst_35 = arith.constant 0.707106769 : f32
    %127 = vector.broadcast %cst_35 : f32 to vector<8x64xf32>
    %128 = arith.mulf %124, %127 : vector<8x64xf32>
    %129 = math.erf %128 : vector<8x64xf32>
    %cst_36 = arith.constant 1.000000e+00 : f32
    %130 = vector.broadcast %cst_36 : f32 to vector<8x64xf32>
    %131 = arith.addf %130, %129 : vector<8x64xf32>
    %132 = arith.mulf %126, %131 : vector<8x64xf32>
    %133 = arith.truncf %132 : vector<8x64xf32> to vector<8x64xbf16>
    %c0_37 = arith.constant 0 : index
    %c0_38 = arith.constant 0 : index
    %134 = vector.load %arg10[%c0_37, %c0_38] : memref<64x32xbf16, #tpu.memory_space<vmem>>, vector<64x32xbf16>
    %cst_39 = arith.constant dense<0.000000e+00> : vector<8x32xf32>
    %135 = tpu.matmul %133, %134, %cst_39 {dimension_numbers = #tpu.dot_dimension_numbers<[1], [0], [0], [1], [0, 0, 1, 1], [], []>} : vector<8x64xbf16>, vector<64x32xbf16>, vector<8x32xf32> -> vector<8x32xf32>
    %c0_40 = arith.constant 0 : index
    %c0_41 = arith.constant 0 : index
    %136 = vector.load %arg11[%c0_40, %c0_41] : memref<1x32xf32, #tpu.memory_space<vmem>>, vector<1x32xf32>
    %137 = vector.shape_cast %136 : vector<1x32xf32> to vector<32xf32>
    %138 = vector.shape_cast %137 : vector<32xf32> to vector<1x32xf32>
    %139 = vector.broadcast %138 : vector<1x32xf32> to vector<8x32xf32>
    %140 = arith.addf %135, %139 : vector<8x32xf32>
    %141 = arith.addf %88, %140 : vector<8x32xf32>
    %c0_42 = arith.constant 0 : index
    %c0_43 = arith.constant 0 : index
    %142 = vector.load %arg12[%c0_42, %c0_43] : memref<1x32xf32, #tpu.memory_space<vmem>>, vector<1x32xf32>
    %143 = vector.shape_cast %142 : vector<1x32xf32> to vector<32xf32>
    %c0_44 = arith.constant 0 : index
    %c0_45 = arith.constant 0 : index
    %144 = vector.load %arg13[%c0_44, %c0_45] : memref<1x32xf32, #tpu.memory_space<vmem>>, vector<1x32xf32>
    %145 = vector.shape_cast %144 : vector<1x32xf32> to vector<32xf32>
    %cst_46 = arith.constant dense<0.000000e+00> : vector<8xf32>
    %146 = vector.multi_reduction <add>, %141, %cst_46 [1] : vector<8x32xf32> to vector<8xf32>
    %147 = vector.shape_cast %146 : vector<8xf32> to vector<8x1xf32>
    %cst_47 = arith.constant 3.200000e+01 : f32
    %148 = vector.broadcast %cst_47 : f32 to vector<8x1xf32>
    %149 = arith.divf %147, %148 : vector<8x1xf32>
    %150 = vector.broadcast %149 : vector<8x1xf32> to vector<8x32xf32>
    %151 = arith.subf %141, %150 : vector<8x32xf32>
    %152 = arith.mulf %151, %151 : vector<8x32xf32>
    %cst_48 = arith.constant dense<0.000000e+00> : vector<8xf32>
    %153 = vector.multi_reduction <add>, %152, %cst_48 [1] : vector<8x32xf32> to vector<8xf32>
    %154 = vector.shape_cast %153 : vector<8xf32> to vector<8x1xf32>
    %cst_49 = arith.constant 3.200000e+01 : f32
    %155 = vector.broadcast %cst_49 : f32 to vector<8x1xf32>
    %156 = arith.divf %154, %155 : vector<8x1xf32>
    %157 = vector.broadcast %149 : vector<8x1xf32> to vector<8x32xf32>
    %158 = arith.subf %141, %157 : vector<8x32xf32>
    %cst_50 = arith.constant 9.99999974E-6 : f32
    %159 = vector.broadcast %cst_50 : f32 to vector<8x1xf32>
    %160 = arith.addf %156, %159 : vector<8x1xf32>
    %161 = math.rsqrt %160 : vector<8x1xf32>
    %162 = vector.broadcast %161 : vector<8x1xf32> to vector<8x32xf32>
    %163 = arith.mulf %158, %162 : vector<8x32xf32>
    %164 = vector.shape_cast %143 : vector<32xf32> to vector<1x32xf32>
    %165 = vector.broadcast %164 : vector<1x32xf32> to vector<8x32xf32>
    %166 = arith.mulf %163, %165 : vector<8x32xf32>
    %167 = vector.shape_cast %145 : vector<32xf32> to vector<1x32xf32>
    %168 = vector.broadcast %167 : vector<1x32xf32> to vector<8x32xf32>
    %169 = arith.addf %166, %168 : vector<8x32xf32>
    %170 = vector.shape_cast %169 : vector<8x32xf32> to vector<1x8x32xf32>
    %c0_51 = arith.constant 0 : index
    %c0_52 = arith.constant 0 : index
    %c0_53 = arith.constant 0 : index
    %171 = vector.load %arg14[%c0_51, %c0_52, %c0_53] : memref<1x8x32xf32, #tpu.memory_space<vmem>>, vector<1x8x32xf32>
    tpu.vector_store %arg14[%c0_51, %c0_52, %c0_53], %170 {strides = array<i32>} : memref<1x8x32xf32, #tpu.memory_space<vmem>>, vector<1x8x32xf32>,
    return
  }
  func.func @transform_0(%arg0: i32) -> (i32, i32, i32) {
    %c0_i32 = arith.constant 0 : i32
    %c0_i32_0 = arith.constant 0 : i32
    %c0_i32_1 = arith.constant 0 : i32
    return %arg0, %c0_i32, %c0_i32_0 : i32, i32, i32
  }
  func.func @transform_1(%arg0: i32) -> (i32, i32) {
    %c0_i32 = arith.constant 0 : i32
    %c0_i32_0 = arith.constant 0 : i32
    %c0_i32_1 = arith.constant 0 : i32
    return %c0_i32, %c0_i32_0 : i32, i32
  }
  func.func @transform_2(%arg0: i32) -> (i32, i32) {
    %c0_i32 = arith.constant 0 : i32
    %c0_i32_0 = arith.constant 0 : i32
    %c0_i32_1 = arith.constant 0 : i32
    return %c0_i32, %c0_i32_0 : i32, i32
  }
  func.func @transform_3(%arg0: i32) -> (i32, i32) {
    %c0_i32 = arith.constant 0 : i32
    %c0_i32_0 = arith.constant 0 : i32
    %c0_i32_1 = arith.constant 0 : i32
    return %c0_i32, %c0_i32_0 : i32, i32
  }
  func.func @transform_4(%arg0: i32) -> (i32, i32) {
    %c0_i32 = arith.constant 0 : i32
    %c0_i32_0 = arith.constant 0 : i32
    %c0_i32_1 = arith.constant 0 : i32
    return %c0_i32, %c0_i32_0 : i32, i32
  }
  func.func @transform_5(%arg0: i32) -> (i32, i32) {
    %c0_i32 = arith.constant 0 : i32
    %c0_i32_0 = arith.constant 0 : i32
    %c0_i32_1 = arith.constant 0 : i32
    return %c0_i32, %c0_i32_0 : i32, i32
  }
  func.func @transform_6(%arg0: i32) -> (i32, i32) {
    %c0_i32 = arith.constant 0 : i32
    %c0_i32_0 = arith.constant 0 : i32
    %c0_i32_1 = arith.constant 0 : i32
    return %c0_i32, %c0_i32_0 : i32, i32
  }
  func.func @transform_7(%arg0: i32) -> (i32, i32) {
    %c0_i32 = arith.constant 0 : i32
    %c0_i32_0 = arith.constant 0 : i32
    %c0_i32_1 = arith.constant 0 : i32
    return %c0_i32, %c0_i32_0 : i32, i32
  }
  func.func @transform_8(%arg0: i32) -> (i32, i32) {
    %c0_i32 = arith.constant 0 : i32
    %c0_i32_0 = arith.constant 0 : i32
    %c0_i32_1 = arith.constant 0 : i32
    return %c0_i32, %c0_i32_0 : i32, i32
  }
  func.func @transform_9(%arg0: i32) -> (i32, i32) {
    %c0_i32 = arith.constant 0 : i32
    %c0_i32_0 = arith.constant 0 : i32
    %c0_i32_1 = arith.constant 0 : i32
    return %c0_i32, %c0_i32_0 : i32, i32
  }
  func.func @transform_10(%arg0: i32) -> (i32, i32) {
    %c0_i32 = arith.constant 0 : i32
    %c0_i32_0 = arith.constant 0 : i32
    %c0_i32_1 = arith.constant 0 : i32
    return %c0_i32, %c0_i32_0 : i32, i32
  }
  func.func @transform_11(%arg0: i32) -> (i32, i32) {
    %c0_i32 = arith.constant 0 : i32
    %c0_i32_0 = arith.constant 0 : i32
    %c0_i32_1 = arith.constant 0 : i32
    return %c0_i32, %c0_i32_0 : i32, i32
  }
  func.func @transform_12(%arg0: i32) -> (i32, i32) {
    %c0_i32 = arith.constant 0 : i32
    %c0_i32_0 = arith.constant 0 : i32
    %c0_i32_1 = arith.constant 0 : i32
    return %c0_i32, %c0_i32_0 : i32, i32
  }
  func.func @transform_13(%arg0: i32) -> (i32, i32, i32) {
    %c0_i32 = arith.constant 0 : i32
    %c0_i32_0 = arith.constant 0 : i32
    %c0_i32_1 = arith.constant 0 : i32
    return %arg0, %c0_i32, %c0_i32_0 : i32, i32, i32
  }
}

</mosaic_0001>

<bundles_post_ra>
// kernel: transformer_forward.3
= control target key start
LH: loop header
LB: loop body
LE: loop exit
PB: predicated region body
PF: predicated region fallthrough
CT: control target
= control target key end

     0   :  { %s1588_s0 = inlined_call_operand.vmem [shape: f32[2,8,32], index: 0, kind: input, shape index: {}]   ;;  %s1589_s1 = inlined_call_operand.vmem [shape: f32[1,32], index: 1, kind: input, shape index: {}]   ;;  %s1590_s2 = inlined_call_operand.vmem [shape: f32[1,32], index: 2, kind: input, shape index: {}]   ;;  %s1591_s3 = inlined_call_operand.vmem [shape: bf16[32,96], index: 3, kind: input, shape index: {}]   ;;  %s1592_s4 = inlined_call_operand.vmem [shape: bf16[32,32], index: 4, kind: input, shape index: {}]   ;;  %s1593_s5 = inlined_call_operand.vmem [shape: f32[1,32], index: 5, kind: input, shape index: {}]   ;;  %s1594_s6 = inlined_call_operand.vmem [shape: f32[1,32], index: 6, kind: input, shape index: {}]   ;;  %s1595_s7 = inlined_call_operand.vmem [shape: bf16[32,64], index: 7, kind: input, shape index: {}]   ;;  %s1596_s8 = inlined_call_operand.vmem [shape: f32[1,64], index: 8, kind: input, shape index: {}]   ;;  %s1597_s9 = inlined_call_operand.vmem [shape: bf16[64,32], index: 9, kind: input, shape index: {}]   ;;  %s1598_s10 = inlined_call_operand.vmem [shape: f32[1,32], index: 10, kind: input, shape index: {}]   ;;  %s1599_s11 = inlined_call_operand.vmem [shape: f32[1,32], index: 11, kind: input, shape index: {}]   ;;  %s1600_s12 = inlined_call_operand.vmem [shape: f32[1,32], index: 12, kind: input, shape index: {}]   ;;  %s1601_s13 = inlined_call_operand.hbm [shape: f32[2,8,32], index: 13, kind: output, shape index: {}]  }
   0x1   :  { %1602 = sst [smem:[#allocation5_spill]] %s1588_s0 }
   0x2   :  { %1603 = sst [smem:[#allocation6_spill]] %s1589_s1 }
   0x3   :  { %1604 = sst [smem:[#allocation7_spill]] %s1590_s2 }
   0x4   :  { %1605 = sst [smem:[#allocation8_spill]] %s1591_s3 }
   0x5   :  { %18 = vsyncpa [#allocation3], 0 }
   0x6   :  { %20 = vsyncpa [#allocation3 + $0x1], 0  ;;  %s1380_s25 = smov 0   ;;  %s1382_s26 = smov 0  }
   0x7   :  { %s1384_s27 = smov 0   ;;  %s1386_s28 = smov 0  }
   0x8 LB: > { %s1401_s29 = sadd.s32 4294967295, %s1299_s28   ;;  %s1082_s30 = sadd.s32 4294967294, %s1299_s28   ;;  %s1299_s28 = sphi %s1386_s28, %s1615_s28   ;;  %s1295_s27 = sphi %s1384_s27, %s1614_s27   ;;  %s1291_s26 = sphi %s1382_s26, %s1613_s26   ;;  %s1287_s25 = sphi %s1380_s25, %s1612_s25  }
   0x9   : > { %s1405_s14 = sadd.s32 1, %s1299_s28   ;;  %s311_s15 = sadd.s32 1, %s1295_s27 }
   0xa   : > { %s308_s16 = ssub.s32 %s1299_s28, %s1405_s14  ;;  %p321_p0 = scmp.ne.s32.totalorder %s1295_s27, %s1291_s26 }
   0xb   : > { %p309_p1 = scmp.eq.s32.totalorder %s308_s16, 0  ;;  %p322_p2 = scmp.eq.s32.totalorder %s1401_s29, 1 }
   0xc   : > { %p327_p3 = scmp.ne.s32.totalorder %s1291_s26, %s1287_s25  ;;  %p328_p4 = scmp.eq.s32.totalorder %s1082_s30, 1 }
   0xd   : > { %s1416_s17 = scalar_select %p309_p1, %s1295_s27, %s311_s15  }
   0xe   : > { %p1418_p5 = por %p322_p2, %p321_p0  ;;  %p1422_p6 = por %p328_p4, %p327_p3 }
   0xf   : > { %p1085_p7 = scmp.ge.s32.totalorder %s1299_s28, 1  ;;  %p389_p8 = scmp.lt.s32.totalorder %s1299_s28, 3 }
  0x11   : > { %p390_p9 = pnand %p1085_p7, %p389_p8 }
  0x12   : > { %p432_p10 = scmp.lt.s32.totalorder (!%p390_p9), %s1401_s29, 1  ;;  %s1608_s0 = sld [smem:[#allocation5_spill]] (!%p390_p9) }
  0x13   : > { %393 = sbr.rel (%p390_p9) target bundleno = 2288 (0x8f0), region = 72  ;;  %s1609_s3 = sld [smem:[#allocation8_spill]] (!%p390_p9) }
  0x14   : > { %s1610_s1 = sld [smem:[#allocation6_spill]] (!%p390_p9)  ;;  %s1302_s30 = smov (!%p390_p9), 104  }
  0x15   : > { %s1611_s2 = sld [smem:[#allocation7_spill]] (!%p390_p9)  ;;  %s1303_s15 = smov (!%p390_p9), 120  }
  0x16   : > { %s1304_s16 = smov (!%p390_p9), 112   ;;  %s1307_s22 = smov (!%p390_p9), 8  }
  0x17   : > { %s1308_s23 = smov (!%p390_p9), 24  }
  0x18   : > { %s433_s20 = scalar_select %p432_p10, %s1401_s29, 1  ;;  %vm440_vm0 = vcmask 261120   ;;  %v1301_v2 = vmov 32.0   ;;  %vm530_vm5 = vcmask 64512   ;;  %vm675_vm6 = vcmask 1043456  }
  0x19   : > { %1211 = vrcp.f32 %v1301_v2  ;;  %v1146_v14 = vld [vmem:[%s1609_s3 + $0x8] sm:$0xff]  ;;  %v1145_v15 = vld [vmem:[%s1609_s3] sm:$0xff]  ;;  %vm768_vm7 = vcmask 130048   ;;  %vm770_vm8 = vcmask 195584  }
  0x1a   : > { %s1087_s21 = sshll.u32 %s433_s20, 3  ;;  %504 = vmatpush.bf16.msra.mxu0 %v1146_v14  ;;  %v1203_v25 = vld [vmem:[%s1610_s1] ss:$0 sm:$0xff]  ;;  %s1305_s20 = smov 96  }
  0x1b   : > { %s435_s24 = scalar_lea.vmem %s1608_s0, %s1087_s21  ;;  %v1204_v28 = vld [vmem:[%s1611_s2] ss:$0 sm:$0xff]  ;;  %s1306_s21 = smov 64  }
  0x1c   : > { %v1433_v0 = vld [vmem:[%s435_s24] sm:$0xff]  ;;  %s1309_s24 = smov 16   ;;  %s1257_s1 = scalar_lea.hbm %s1601_s13, 16 }
  0x1d   : > { %v441_v1 = vsel %vm440_vm0, %v1433_v0, 0.0 }
  0x1e   : > { %442 = vadd.xlane.f32.xlu0 %v441_v1  ;;  %505 = vmatpush.bf16.msra.mxu0 %v1145_v15 }
  0x1f   : > { %v1212_v3 = vpop.eup %1211 }
  0x20   : > { %v445_v4 = vmul.f32 32.0, %v1212_v3  ;;  %vm449_vm1 = vweird.f32 %v1212_v3 }
  0x22   : > { %v446_v5 = vsub.f32 1.0, %v445_v4 }
  0x24   : > { %v447_v6 = vmul.f32 %v1212_v3, %v446_v5 }
  0x26   : > { %v448_v7 = vadd.f32 %v1212_v3, %v447_v6 }
  0x28   : > { %v1437_v8 = vsel %vm449_vm1, %v1212_v3, %v448_v7  ;;  %vm956_vm1 = vcmask 523264  }
  0x91   : > { %v443_v9 = vpop.xlane.xlu0 %442 }
  0x92   : > { %v451_v10 = vmul.f32 %v1437_v8, %v443_v9 }
  0x94   : > { %v452_v11 = vsub.f32 %v1433_v0, %v451_v10 }
  0x96   : > { %v453_v12 = vmul.f32 %v452_v11, %v452_v11 }
  0x98   : > { %v454_v13 = vsel %vm440_vm0, %v453_v12, 0.0 }
  0x99   : > { %455 = vadd.xlane.f32.xlu0 %v454_v13 }
 0x10c   : > { %v456_v16 = vpop.xlane.xlu0 %455 }
 0x10d   : > { %v457_v17 = vmul.f32 %v456_v16, %v1437_v8 }
 0x10f   : > { %v458_v18 = vadd.f32 1e-05, %v457_v17 }
 0x111   : > { %1213 = vrsqrt.f32 %v458_v18  ;;  %vm465_vm3 = vweird.f32 %v458_v18 }
 0x117   : > { %v1214_v19 = vpop.eup %1213 }
 0x118   : > { %v460_v20 = vmul.f32 %v1214_v19, %v458_v18  ;;  %vm466_vm2 = vweird.f32 %v1214_v19 }
 0x119   : > { %vm467_vm4 = vmor %vm465_vm3, %vm466_vm2 }
 0x11a   : > { %v461_v21 = vmul.f32 %v1214_v19, %v460_v20 }
 0x11c   : > { %v462_v22 = vmul.f32 0.5, %v461_v21 }
 0x11e   : > { %v463_v23 = vsub.f32 1.5, %v462_v22 }
 0x120   : > { %v464_v24 = vmul.f32 %v1214_v19, %v463_v23 }
 0x122   : > { %v468_v26 = vsel %vm467_vm4, %v1214_v19, %v464_v24 }
 0x123   : > { %v469_v27 = vmul.f32 %v468_v26, %v452_v11 }
 0x125   : > { %v473_v29 = vmul.f32 %v1203_v25, %v469_v27 }
 0x127   : > { %v477_v30 = vadd.f32 %v1204_v28, %v473_v29 }
 0x129   : > { %v478_v31 = vpack.c.bf16 %v477_v30, %v477_v30 }
 0x12b   : > { %1096 = vmatmul.msk.bf16.vlgmr.msra.gmra.mxu0 %vm440_vm0, %v478_v31 }
 0x1a8   : > { %v507_v32 = vpop.f32.mrf.mxu0 }
 0x1a9   : > { %518 = vrot.lane.b32.xlu2 %v507_v32, %s1302_s30  ;;  %512 = vrot.lane.b32.xlu1 %v507_v32, %s1303_s15  ;;  %v521_v41 = vpack.c.bf16 %v507_v32, %v507_v32  ;;  %s429_s30 = sand.u32 1, %s1291_s26  }
 0x1aa   : > { %s1086_s15 = sshll.u32 %s429_s30, 3 }
 0x1ab   : > { %v526_v45 = vunpack.c.l.b16 %v521_v41  ;;  %s431_s2 = scalar_lea.vmem [#allocation2], %s1086_s15 }
 0x1ad   : > { %v1461_v48 = vpack.c.b16 %v526_v45, %v526_v45 }
 0x1b0   : > { %v509_v33 = vpop.f32.mrf.mxu0 }
 0x1b1   : > { %515 = vrot.lane.b32.xlu1 %v507_v32, %s1304_s16  ;;  %s1142_s16 = sshll.u32 %s1401_s29, 3  ;;  %s1020_s29 = sshll.u32 %s431_s2, 4  ;;  %s1021_s29 = int_to_ptr.vmem [resolvable:$true] %s1020_s29 }
 0x203   : > { %v519_v34 = vpop.permute.xlu2 %518 }
 0x204   : > { %v524_v35 = vpack.c.bf16 %v519_v34, %v519_v34 }
 0x206   : > { %v599_v36 = vunpack.c.l.b16 %v524_v35 }
 0x208   : > { %v1456_v37 = vpack.c.b16 %v599_v36, %v599_v36 }
 0x20a   : > { %601 = vrot.lane.b32.xlu1 %v1456_v37, %s1305_s20 }
 0x21b   : > { %v513_v38 = vpop.permute.xlu1 %512 }
 0x21c   : > { %v522_v39 = vpack.c.bf16 %v513_v38, %v513_v38 }
 0x21e   : > { %v551_v40 = vunpack.c.l.b16 %v522_v39 }
 0x220   : > { %v552_v42 = vpack.c.b16 %v551_v40, %v551_v40 }
 0x222   : > { %553 = vrot.lane.b32.xlu2 %v552_v42, %s1305_s20 }
 0x223   : > { %v516_v43 = vpop.permute.xlu1 %515 }
 0x224   : > { %v523_v44 = vpack.c.bf16 %v516_v43, %v516_v43 }
 0x226   : > { %v575_v46 = vunpack.c.l.b16 %v523_v44 }
 0x228   : > { %v1459_v47 = vpack.c.b16 %v575_v46, %v575_v46 }
 0x22a   : > { %577 = vrot.lane.b32.xlu0 %v1459_v47, %s1305_s20  ;;  %528 = vrot.lane.b32.xlu2 %v1461_v48, %s1305_s20  ;;  %s1008_s20 = scalar_lea.sflag [#allocation3], %s429_s30 }
 0x27c   : > { %v554_v49 = vpop.permute.xlu2 %553  ;;  %v602_v50 = vpop.permute.xlu1 %601 }
 0x27d   : > { %v559_v51 = vsel %vm530_vm5, %v554_v49, 0  ;;  %v607_v52 = vsel %vm530_vm5, %v602_v50, 0 }
 0x27e   : > { %568 = vmatpush.bf16.xpose.msra.mxu2 %v559_v51  ;;  %616 = vmatpush.bf16.xpose.msrb.mxu0 %v607_v52 }
 0x284   : > { %v529_v53 = vpop.permute.xlu2 %528 }
 0x285   : > { %1098 = vmatmul.msk.bf16.vlgmr.msra.gmra.mxu2 %vm530_vm5, %v522_v39  ;;  %1100 = vmatmul.msk.bf16.vlgmr.msrb.gmra.mxu0 %vm530_vm5, %v524_v35  ;;  %v535_v54 = vsel %vm530_vm5, %v529_v53, 0 }
 0x286   : > { %544 = vmatpush.bf16.xpose.msra.mxu1 %v535_v54 }
 0x28d   : > { %1097 = vmatmul.msk.bf16.vlgmr.msra.gmra.mxu1 %vm530_vm5, %v521_v41 }
 0x29c   : > { %v578_v55 = vpop.permute.xlu0 %577 }
 0x29d   : > { %v583_v56 = vsel %vm530_vm5, %v578_v55, 0 }
 0x29e   : > { %592 = vmatpush.bf16.xpose.msra.mxu3 %v583_v56 }
 0x2a5   : > { %1099 = vmatmul.msk.bf16.vlgmr.msra.gmra.mxu3 %vm530_vm5, %v523_v44 }
 0x302   : > { %v618_v57 = vpop.f32.mrf.mxu0 }
 0x303   : > { %v631_v58 = vsel %vm530_vm5, %v618_v57, -inf }
 0x304   : > { %632 = vmax.xlane.f32.xlu0 %v631_v58 }
 0x308   : > { %v570_v59 = vpop.f32.mrf.mxu2 }
 0x309   : > { %v625_v60 = vsel %vm530_vm5, %v570_v59, -inf }
 0x30a   : > { %626 = vmax.xlane.f32.xlu1 %v625_v60  ;;  %v546_v61 = vpop.f32.mrf.mxu1  ;;  %v620_v62 = vpop.f32.mrf.mxu0  ;;  %v1147_v60 = vld [vmem:[%s1592_s4] sm:$0xff] }
 0x30b   : > { %v622_v5 = vsel %vm530_vm5, %v546_v61, -inf }
 0x310   : > { %v572_v63 = vpop.f32.mrf.mxu2 }
 0x312   : > { %v548_v1 = vpop.f32.mrf.mxu1 }
 0x318   : > { %692 = vrot.lane.b32.xlu0 %v552_v42, %s1306_s21 }
 0x328   : > { %v594_v2 = vpop.f32.mrf.mxu3 }
 0x329   : > { %v628_v3 = vsel %vm530_vm5, %v594_v2, -inf }
 0x32a   : > { %629 = vmax.xlane.f32.xlu2 %v628_v3 }
 0x330   : > { %v596_v4 = vpop.f32.mrf.mxu3 }
 0x332   : > { %623 = vmax.xlane.f32.xlu2 %v622_v5 }
 0x377   : > { %v633_v6 = vpop.xlane.xlu0 %632 }
 0x378   : > { %v637_v7 = vsub.f32 %v618_v57, %v633_v6 }
 0x37a   : > { %v644_v9 = vmul.f32 1.442695, %v637_v7 }
 0x37c   : > { %1215 = vpow2.f32 %v644_v9 }
 0x37d   : > { %v627_v10 = vpop.xlane.xlu1 %626 }
 0x37e   : > { %v635_v11 = vsub.f32 %v570_v59, %v627_v10  ;;  %v1148_v59 = vld [vmem:[%s1592_s4 + $0x8] sm:$0xff] }
 0x380   : > { %v640_v12 = vmul.f32 1.442695, %v635_v11 }
 0x382   : > { %v1216_v13 = vpop.eup %1215  ;;  %1217 = vpow2.f32 %v640_v12 }
 0x383   : > { %v655_v14 = vsel %vm530_vm5, %v1216_v13, 0.0 }
 0x384   : > { %656 = vadd.xlane.f32.xlu1 %v655_v14 }
 0x388   : > { %v1218_v15 = vpop.eup %1217 }
 0x389   : > { %v649_v17 = vsel %vm530_vm5, %v1218_v15, 0.0 }
 0x38a   : > { %v693_v16 = vpop.permute.xlu0 %692 }
 0x38b   : > { %v698_v18 = vsel %vm675_vm6, %v693_v16, 0 }
 0x38c   : > { %650 = vadd.xlane.f32.xlu1 %v649_v17  ;;  %707 = vmatpush.bf16.msrb.mxu2 %v698_v18 }
 0x39d   : > { %v630_v19 = vpop.xlane.xlu2 %629 }
 0x39e   : > { %v636_v20 = vsub.f32 %v594_v2, %v630_v19 }
 0x3a0   : > { %v642_v21 = vmul.f32 1.442695, %v636_v20 }
 0x3a2   : > { %1219 = vpow2.f32 %v642_v21 }
 0x3a5   : > { %v624_v22 = vpop.xlane.xlu2 %623  ;;  %734 = vrot.lane.b32.xlu1 %v1456_v37, %s1306_s21 }
 0x3a6   : > { %v634_v23 = vsub.f32 %v546_v61, %v624_v22 }
 0x3a8   : > { %v1220_v24 = vpop.eup %1219  ;;  %v638_v25 = vmul.f32 1.442695, %v634_v23 }
 0x3a9   : > { %v652_v26 = vsel %vm530_vm5, %v1220_v24, 0.0 }
 0x3aa   : > { %1221 = vpow2.f32 %v638_v25  ;;  %653 = vadd.xlane.f32.xlu2 %v652_v26  ;;  %v1205_v25 = vld [vmem:[%s1593_s5] ss:$0 sm:$0xff] }
 0x3b0   : > { %v1222_v27 = vpop.eup %1221 }
 0x3b1   : > { %v646_v28 = vsel %vm530_vm5, %v1222_v27, 0.0 }
 0x3b2   : > { %647 = vadd.xlane.f32.xlu0 %v646_v28  ;;  %v1206_v28 = vld [vmem:[%s1594_s6] ss:$0 sm:$0xff] }
 0x3c2   : > { %713 = vrot.lane.b32.xlu2 %v1459_v47, %s1306_s21 }
 0x3ca   : > { %670 = vrot.lane.b32.xlu2 %v1461_v48, %s1306_s21 }
 0x3f7   : > { %v657_v29 = vpop.xlane.xlu1 %656 }
 0x3ff   : > { %v651_v30 = vpop.xlane.xlu1 %650 }
 0x400   : > { %1223 = vrcp.f32 %v651_v30 }
 0x401   : > { %1225 = vrcp.f32 %v657_v29 }
 0x406   : > { %v1224_v31 = vpop.eup %1223 }
 0x407   : > { %v663_v32 = vmul.f32 %v1224_v31, %v1218_v15  ;;  %v1226_v34 = vpop.eup %1225  ;;  %v1150_v15 = vld [vmem:[%s1595_s7 + $0x8] sm:$0xff] }
 0x408   : > { %v665_v35 = vmul.f32 %v1226_v34, %v1216_v13  ;;  %868 = vmatpush.bf16.msra.mxu2 %v1150_v15 }
 0x409   : > { %v667_v33 = vpack.c.bf16 %v663_v32, %v663_v32  ;;  %v1207_v32 = vld [vmem:[%s1596_s8] ss:$0 sm:$0xff] }
 0x40a   : > { %v669_v38 = vpack.c.bf16 %v665_v35, %v665_v35 }
 0x40b   : > { %1102 = vmatmul.msk.bf16.vlgmr.msrb.gmra.mxu2 %vm530_vm5, %v667_v33 }
 0x417   : > { %v735_v36 = vpop.permute.xlu1 %734 }
 0x418   : > { %v740_v37 = vsel %vm675_vm6, %v735_v36, 0 }
 0x419   : > { %749 = vmatpush.bf16.msra.mxu0 %v740_v37 }
 0x41c   : > { %1104 = vmatmul.msk.bf16.vlgmr.msra.gmra.mxu0 %vm530_vm5, %v669_v38 }
 0x41d   : > { %v654_v39 = vpop.xlane.xlu2 %653 }
 0x41e   : > { %1227 = vrcp.f32 %v654_v39  ;;  %v1154_v39 = vld [vmem:[%s1597_s9 + $0x18] sm:$0xff] }
 0x424   : > { %v1228_v40 = vpop.eup %1227 }
 0x425   : > { %v664_v41 = vmul.f32 %v1228_v40, %v1220_v24  ;;  %v714_v42 = vpop.permute.xlu2 %713  ;;  %v648_v43 = vpop.xlane.xlu0 %647 }
 0x426   : > { %1229 = vrcp.f32 %v648_v43  ;;  %v719_v44 = vsel %vm675_vm6, %v714_v42, 0 }
 0x427   : > { %728 = vmatpush.bf16.msrb.mxu3 %v719_v44  ;;  %v668_v45 = vpack.c.bf16 %v664_v41, %v664_v41  ;;  %v1153_v44 = vld [vmem:[%s1597_s9 + $0x10] sm:$0xff] }
 0x42a   : > { %1103 = vmatmul.msk.bf16.vlgmr.msrb.gmra.mxu3 %vm530_vm5, %v668_v45 }
 0x42b   : > { %964 = vmatpush.bf16.msra.mxu3 %v1154_v39  ;;  %v1210_v39 = vld [vmem:[%s1600_s12] ss:$0 sm:$0xff] }
 0x42c   : > { %v1230_v46 = vpop.eup %1229 }
 0x42d   : > { %v662_v47 = vmul.f32 %v1230_v46, %v1222_v27  ;;  %v671_v48 = vpop.permute.xlu2 %670 }
 0x42e   : > { %v677_v49 = vsel %vm675_vm6, %v671_v48, 0 }
 0x42f   : > { %686 = vmatpush.bf16.msrb.mxu1 %v677_v49  ;;  %v666_v50 = vpack.c.bf16 %v662_v47, %v662_v47  ;;  %965 = vmatpush.bf16.msra.mxu3 %v1153_v44  ;;  %v1152_v49 = vld [vmem:[%s1597_s9 + $0x8] sm:$0xff] }
 0x432   : > { %1101 = vmatmul.msk.bf16.vlgmr.msrb.gmra.mxu1 %vm530_vm5, %v666_v50 }
 0x433   : > { %798 = vmatpush.bf16.msra.mxu1 %v1148_v59  ;;  %966 = vmatpush.bf16.msra.mxu3 %v1152_v49 }
 0x437   : > { %799 = vmatpush.bf16.msra.mxu1 %v1147_v60 }
 0x48e   : > { %v709_v51 = vpop.f32.mrf.mxu2 }
 0x48f   : > { %756 = vrot.lane.b32.xlu1 %v709_v51, %s1307_s22 }
 0x496   : > { %v711_v52 = vpop.f32.mrf.mxu2 }
 0x499   : > { %v751_v53 = vpop.f32.mrf.mxu0 }
 0x49a   : > { %764 = vrot.lane.b32.xlu1 %v751_v53, %s1308_s23  ;;  %v1151_v53 = vld [vmem:[%s1597_s9] sm:$0xff] }
 0x49b   : > { %967 = vmatpush.bf16.msra.mxu3 %v1151_v53 }
 0x4a1   : > { %v753_v54 = vpop.f32.mrf.mxu0 }
 0x4ad   : > { %v730_v55 = vpop.f32.mrf.mxu3 }
 0x4ae   : > { %760 = vrot.lane.b32.xlu2 %v730_v55, %s1309_s24  ;;  %s1018_s24 = scalar_lea.hbm %s1601_s13, %s1142_s16 }
 0x4af   : > { %v688_v56 = vpop.f32.mrf.mxu1  ;;  %s1022_s3 = sshll.u32 %s1018_s24, 4  ;;  %s1023_s3 = int_to_ptr.hbm [resolvable:$true] %s1022_s3 }
 0x4b0   : > { %s1251_s21 = sshra.s32 %s1023_s3, 4  ;;  %s1252_s21 = int_to_ptr.hbm [resolvable:$true] %s1251_s21 }
 0x4b1   : > { %s1253_s16 = scalar_lea.hbm %s1252_s21, 8  ;;  %p1258_p0 = scmp.lt.s32.totalorder %s1252_s21, %s1601_s13 }
 0x4b2   : > { %p1254_p11 = scmp.ne.s32.totalorder %s1252_s21, %s1253_s16  ;;  %p1259_p1 = scmp.lt.s32.totalorder %s1257_s1, %s1253_s16 }
 0x4b4   : > { %p1255_p12 = pnand %p1254_p11, %p1418_p5  ;;  %p1260_p2 = por %p1259_p1, %p1258_p0 }
 0x4b5   : > { %v732_v57 = vpop.f32.mrf.mxu3 }
 0x4b6   : > { %p1256_p13 = pneg %p1255_p12 }
 0x4b7   : > { %v690_v58 = vpop.f32.mrf.mxu1 }
 0x4b8   : > { %p1261_p3 = pnand %p1260_p2, %p1256_p13 }
 0x501   : > { %v757_v61 = vpop.permute.xlu1 %756 }
 0x502   : > { %v767_v63 = vsel %vm530_vm5, %v688_v56, %v757_v61 }
 0x508   : > { %v761_v62 = vpop.permute.xlu2 %760 }
 0x509   : > { %v769_v1 = vsel %vm768_vm7, %v767_v63, %v761_v62 }
 0x50c   : > { %v765_v2 = vpop.permute.xlu1 %764 }
 0x50d   : > { %v771_v3 = vsel %vm770_vm8, %v769_v1, %v765_v2 }
 0x50e   : > { %v772_v4 = vpack.c.bf16 %v771_v3, %v771_v3 }
 0x510   : > { %1113 = vmatmul.msk.bf16.vlgmr.msra.gmra.mxu1 %vm440_vm0, %v772_v4 }
 0x58d   : > { %v801_v5 = vpop.f32.mrf.mxu1 }
 0x58e   : > { %v1505_v6 = vadd.f32 %v801_v5, %v1433_v0  ;;  %v1149_v0 = vld [vmem:[%s1595_s7] sm:$0xff] }
 0x58f   : > { %869 = vmatpush.bf16.msra.mxu2 %v1149_v0 }
 0x590   : > { %v808_v7 = vsel %vm440_vm0, %v1505_v6, 0.0 }
 0x591   : > { %809 = vadd.xlane.f32.xlu2 %v808_v7 }
 0x595   : > { %v803_v9 = vpop.f32.mrf.mxu1 }
 0x604   : > { %v810_v10 = vpop.xlane.xlu2 %809 }
 0x605   : > { %v811_v11 = vmul.f32 %v810_v10, %v1437_v8 }
 0x607   : > { %v812_v12 = vsub.f32 %v1505_v6, %v811_v11 }
 0x609   : > { %v813_v13 = vmul.f32 %v812_v12, %v812_v12 }
 0x60b   : > { %v814_v14 = vsel %vm440_vm0, %v813_v13, 0.0 }
 0x60c   : > { %815 = vadd.xlane.f32.xlu1 %v814_v14 }
 0x67f   : > { %v816_v16 = vpop.xlane.xlu1 %815 }
 0x680   : > { %v817_v17 = vmul.f32 %v816_v16, %v1437_v8 }
 0x682   : > { %v818_v18 = vadd.f32 1e-05, %v817_v17 }
 0x684   : > { %1231 = vrsqrt.f32 %v818_v18  ;;  %vm825_vm10 = vweird.f32 %v818_v18 }
 0x68a   : > { %v1232_v19 = vpop.eup %1231 }
 0x68b   : > { %v820_v20 = vmul.f32 %v1232_v19, %v818_v18  ;;  %vm826_vm9 = vweird.f32 %v1232_v19  ;;  %v1208_v18 = vld [vmem:[%s1598_s10] ss:$0 sm:$0xff] }
 0x68c   : > { %vm827_vm11 = vmor %vm825_vm10, %vm826_vm9 }
 0x68d   : > { %v821_v21 = vmul.f32 %v1232_v19, %v820_v20 }
 0x68f   : > { %v822_v22 = vmul.f32 0.5, %v821_v21 }
 0x691   : > { %v823_v23 = vsub.f32 1.5, %v822_v22 }
 0x693   : > { %v824_v24 = vmul.f32 %v1232_v19, %v823_v23 }
 0x695   : > { %v828_v26 = vsel %vm827_vm11, %v1232_v19, %v824_v24 }
 0x696   : > { %v829_v27 = vmul.f32 %v828_v26, %v812_v12 }
 0x698   : > { %v833_v29 = vmul.f32 %v1205_v25, %v829_v27 }
 0x69a   : > { %v837_v30 = vadd.f32 %v1206_v28, %v833_v29 }
 0x69c   : > { %v838_v31 = vpack.c.bf16 %v837_v30, %v837_v30 }
 0x69e   : > { %1122 = vmatmul.msk.bf16.vlgmr.msra.gmra.mxu2 %vm440_vm0, %v838_v31 }
 0x721   : > { %v871_v33 = vpop.f32.mrf.mxu2 }
 0x722   : > { %v872_v34 = vadd.f32 %v1207_v32, %v871_v33 }
 0x724   : > { %v876_v35 = vmul.f32 0.70710677, %v872_v34  ;;  %v875_v15 = vmul.f32 0.5, %v872_v34 }
 0x726   : > { %v877_v36 = vmul.f32 %v876_v35, %v876_v35 }
 0x728   : > { %v878_v37 = vmin.f32 %v877_v36, 16.0 }
 0x729   : > { %v873_v38 = vpop.f32.mrf.mxu2 }
 0x72a   : > { %v879_v40 = vmul.f32 2.1237322e-06, %v878_v37  ;;  %v890_v41 = vmul.f32 3.8918573e-05, %v878_v37 }
 0x72c   : > { %v880_v42 = vadd.f32 0.00028619796, %v879_v40  ;;  %v891_v43 = vadd.f32 0.001143296, %v890_v41 }
 0x72e   : > { %v881_v45 = vmul.f32 %v880_v42, %v878_v37  ;;  %v892_v46 = vmul.f32 %v891_v43, %v878_v37 }
 0x730   : > { %v893_v47 = vadd.f32 0.014752088, %v892_v46  ;;  %v882_v48 = vadd.f32 0.0036580483, %v881_v45 }
 0x732   : > { %v894_v50 = vmul.f32 %v893_v47, %v878_v37  ;;  %v883_v52 = vmul.f32 %v882_v48, %v878_v37 }
 0x734   : > { %v895_v51 = vadd.f32 0.112945676, %v894_v50  ;;  %v884_v56 = vadd.f32 0.05243302, %v883_v52 }
 0x736   : > { %v896_v54 = vmul.f32 %v895_v51, %v878_v37  ;;  %v885_v59 = vmul.f32 %v884_v56, %v878_v37 }
 0x738   : > { %v897_v55 = vadd.f32 0.4994258, %v896_v54  ;;  %v886_v60 = vadd.f32 0.18741608, %v885_v59 }
 0x73a   : > { %v898_v57 = vmul.f32 %v897_v55, %v878_v37  ;;  %v887_v62 = vmul.f32 %v886_v60, %v878_v37  ;;  %v1209_v37 = vld [vmem:[%s1599_s11] ss:$0 sm:$0xff] }
 0x73c   : > { %v899_v58 = vadd.f32 1.0, %v898_v57  ;;  %v888_v3 = vadd.f32 1.1283791, %v887_v62 }
 0x73e   : > { %1233 = vrcp.f32 %v899_v58  ;;  %v911_v2 = vand.u32 2147483648, %v899_v58  ;;  %v909_v5 = vand.u32 2147483647, %v899_v58  ;;  %vm905_vm13 = vweird.f32 %v899_v58 }
 0x73f   : > { %v889_v10 = vmul.f32 %v888_v3, %v876_v35 }
 0x740   : > { %v912_v9 = vor.u32 1.1754944e-38, %v911_v2  ;;  %vm910_vm15 = vcmp.eq.f32.partialorder %v909_v5, 8.507059e+37 }
 0x744   : > { %v1234_v61 = vpop.eup %1233 }
 0x745   : > { %v901_v63 = vmul.f32 %v1234_v61, %v899_v58  ;;  %vm906_vm12 = vweird.f32 %v1234_v61 }
 0x746   : > { %vm907_vm14 = vmor %vm905_vm13, %vm906_vm12 }
 0x747   : > { %v902_v1 = vsub.f32 1.0, %v901_v63 }
 0x749   : > { %v903_v4 = vmul.f32 %v1234_v61, %v902_v1 }
 0x74b   : > { %v904_v7 = vadd.f32 %v1234_v61, %v903_v4 }
 0x74d   : > { %v908_v11 = vsel %vm907_vm14, %v1234_v61, %v904_v7 }
 0x74e   : > { %v913_v12 = vsel %vm910_vm15, %v912_v9, %v908_v11 }
 0x74f   : > { %v914_v13 = vmul.f32 %v913_v12, %v889_v10 }
 0x751   : > { %v1123_v14 = vclamps-f32 %v914_v13, 1.0 }
 0x753   : > { %v917_v0 = vadd.f32 1.0, %v1123_v14 }
 0x755   : > { %v918_v16 = vmul.f32 %v917_v0, %v875_v15 }
 0x757   : > { %v919_v17 = vpack.c.bf16 %v918_v16, %v918_v16 }
 0x759   : > { %1140 = vmatmul.msk.bf16.vlgmr.msra.gmra.mxu3 %vm956_vm1, %v919_v17 }
 0x7dc   : > { %v969_v19 = vpop.f32.mrf.mxu3 }
 0x7dd   : > { %v970_v20 = vadd.f32 %v1208_v18, %v969_v19 }
 0x7df   : > { %v973_v21 = vadd.f32 %v970_v20, %v1505_v6 }
 0x7e1   : > { %v976_v22 = vsel %vm440_vm0, %v973_v21, 0.0 }
 0x7e2   : > { %977 = vadd.xlane.f32.xlu0 %v976_v22 }
 0x7e4   : > { %v971_v23 = vpop.f32.mrf.mxu3 }
 0x855   : > { %v978_v24 = vpop.xlane.xlu0 %977 }
 0x856   : > { %v979_v25 = vmul.f32 %v978_v24, %v1437_v8 }
 0x858   : > { %v980_v26 = vsub.f32 %v973_v21, %v979_v25 }
 0x85a   : > { %v981_v27 = vmul.f32 %v980_v26, %v980_v26 }
 0x85c   : > { %v982_v28 = vsel %vm440_vm0, %v981_v27, 0.0 }
 0x85d   : > { %983 = vadd.xlane.f32.xlu0 %v982_v28 }
 0x8d0   : > { %v984_v29 = vpop.xlane.xlu0 %983 }
 0x8d1   : > { %v985_v30 = vmul.f32 %v984_v29, %v1437_v8 }
 0x8d3   : > { %v986_v31 = vadd.f32 1e-05, %v985_v30 }
 0x8d5   : > { %1235 = vrsqrt.f32 %v986_v31  ;;  %vm993_vm3 = vweird.f32 %v986_v31 }
 0x8db   : > { %v1236_v6 = vpop.eup %1235 }
 0x8dc   : > { %v988_v32 = vmul.f32 %v1236_v6, %v986_v31  ;;  %vm994_vm2 = vweird.f32 %v1236_v6 }
 0x8dd   : > { %vm995_vm4 = vmor %vm993_vm3, %vm994_vm2 }
 0x8de   : > { %v989_v33 = vmul.f32 %v1236_v6, %v988_v32 }
 0x8e0   : > { %v990_v34 = vmul.f32 0.5, %v989_v33 }
 0x8e2   : > { %v991_v35 = vsub.f32 1.5, %v990_v34 }
 0x8e4   : > { %v992_v36 = vmul.f32 %v1236_v6, %v991_v35 }
 0x8e6   : > { %v996_v8 = vsel %vm995_vm4, %v1236_v6, %v992_v36 }
 0x8e7   : > { %v997_v38 = vmul.f32 %v996_v8, %v980_v26 }
 0x8e9   : > { %v1001_v40 = vmul.f32 %v1209_v37, %v997_v38 }
 0x8eb   : > { %v1005_v41 = vadd.f32 %v1210_v39, %v1001_v40 }
 0x8ed   : > { %1006 = vst.msk [vmem:[%s431_s2] sm:$0xff] %vm440_vm0, %v1005_v41 }
 0x8ee   : > { %1264 = shalt.err (!%p1261_p3)
}
 0x8ef   : > { %1155 = dma.vmem_to_hbm [thread:$0]  (%p1418_p5), %s1021_s29, 128, %s1023_s3, %s1008_s20  }
 0x8f0 PF: > { %p1161_p4 = scmp.ge.s32.totalorder %s1299_s28, 2  ;;  %s1034_s2 = sand.u32 1, %s1287_s25  }
 0x8f1   : > { %s1035_s30 = scalar_lea.sflag [#allocation3], %s1034_s2 }
 0x8f2   : > { %p1158_p7 = pnand %p1161_p4, %p1422_p6 }
 0x8f4   : > { %p1159_p8 = pneg %p1158_p7 }
 0x8f6   : > { %1282 = dma.done.wait (%p1159_p8), %s1035_s30, 128  }
 0x8f7   : > { %1284 = vsyncadd (%p1159_p8), %s1035_s30, 4294967168  ;;  %p23_p9 = scmp.ge.s32.totalorder %s1405_s14, 4   ;;  %s1612_s25 = smov %s1291_s26 }
 0x8f8   : > { %s1613_s26 = smov %s1295_s27  ;;  %s1614_s27 = smov %s1416_s17 }
 0x8f9   : > { %s1615_s28 = smov %s1405_s14  ;;  %25 = sbr.rel (!%p23_p9) target bundleno = 8 (0x8), region = 107 }
 0x8fe   :  { %1041 = vsyncpa [#allocation3], 1 }
 0x8ff   :  { %1043 = vsyncpa [#allocation3 + $0x1], 1 }

// kernel: transformer_forward.2
= control target key start
LH: loop header
LB: loop body
LE: loop exit
PB: predicated region body
PF: predicated region fallthrough
CT: control target
= control target key end

     0   :  { %18 = vsyncpa [#allocation3], 0  ;;  %s1766_s0 = inlined_call_operand.vmem [shape: f32[2,8,32], index: 0, kind: input, shape index: {}]   ;;  %s1767_s1 = inlined_call_operand.hbm [shape: f32[1,32], index: 1, kind: input, shape index: {}]   ;;  %s1768_s2 = inlined_call_operand.hbm [shape: f32[1,32], index: 2, kind: input, shape index: {}]   ;;  %s1769_s3 = inlined_call_operand.vmem [shape: bf16[32,96], index: 3, kind: input, shape index: {}]   ;;  %s1770_s4 = inlined_call_operand.vmem [shape: bf16[32,32], index: 4, kind: input, shape index: {}]   ;;  %s1771_s5 = inlined_call_operand.vmem [shape: f32[1,32], index: 5, kind: input, shape index: {}]   ;;  %s1772_s6 = inlined_call_operand.vmem [shape: f32[1,32], index: 6, kind: input, shape index: {}]   ;;  %s1773_s7 = inlined_call_operand.hbm [shape: bf16[32,64], index: 7, kind: input, shape index: {}]   ;;  %s1774_s8 = inlined_call_operand.hbm [shape: f32[1,64], index: 8, kind: input, shape index: {}]   ;;  %s1775_s9 = inlined_call_operand.vmem [shape: bf16[64,32], index: 9, kind: input, shape index: {}]   ;;  %s1776_s10 = inlined_call_operand.hbm [shape: f32[1,32], index: 10, kind: input, shape index: {}]   ;;  %s1777_s11 = inlined_call_operand.vmem [shape: f32[1,32], index: 11, kind: input, shape index: {}]   ;;  %s1778_s12 = inlined_call_operand.vmem [shape: f32[1,32], index: 12, kind: input, shape index: {}]   ;;  %s1779_s13 = inlined_call_operand.vmem [shape: f32[2,8,32], index: 13, kind: output, shape index: {}]  }
   0x1   :  { %19 = vsyncpa [#allocation5], 0 }
   0x2   :  { %20 = vsyncpa [#allocation8], 0  ;;  %s1591_s25 = smov 0  }
   0x3 LB: > { %s359_s11 = sshll.u32 %s1768_s2, 4  ;;  %s1600_s12 = sadd.s32 4294967295, %s1503_s25   ;;  %s1503_s25 = sphi %s1591_s25, %s26_s25   ;;  %s360_s11 = int_to_ptr.hbm [resolvable:$true] %s359_s11 }
   0x4   : > { %p1155_p0 = scmp.ge.s32.totalorder %s1503_s25, 1  ;;  %p335_p1 = scmp.lt.s32.totalorder %s1503_s25, 3 }
   0x5   : > { %p1271_p2 = scmp.eq.s32.totalorder %s1600_s12, 0  ;;  %s1505_s29 = smov [#allocation4]  }
   0x6   : > { %p1605_p3 = pnand %p1155_p0, %p335_p1  ;;  %s361_s30 = sshll.u32 %s1505_s29, 4  ;;  %s362_s30 = int_to_ptr.vmem [resolvable:$true] %s361_s30 }
   0x7   : > { %s397_s16 = sshll.u32 %s1774_s8, 4  ;;  %s347_s19 = sshll.u32 %s1767_s1, 4  ;;  %s398_s16 = int_to_ptr.hbm [resolvable:$true] %s397_s16  ;;  %s348_s19 = int_to_ptr.hbm [resolvable:$true] %s347_s19 }
   0x8   : > { %p1255_p4 = pneg %p1605_p3  ;;  %s1506_s21 = smov [#allocation7]  }
   0x9   : > { %s399_s22 = sshll.u32 %s1506_s21, 4  ;;  %s1507_s23 = smov [#allocation2]   ;;  %s400_s22 = int_to_ptr.vmem [resolvable:$true] %s399_s22 }
   0xa   : > { %p1619_p5 = pnand %p1271_p2, %p1255_p4  ;;  %s349_s24 = sshll.u32 %s1507_s23, 4  ;;  %s350_s24 = int_to_ptr.vmem [resolvable:$true] %s349_s24 }
   0xb   : > { %s382_s29 = sshll.u32 %s1773_s7, 4  ;;  %s1508_s14 = smov [#allocation6]   ;;  %s383_s29 = int_to_ptr.hbm [resolvable:$true] %s382_s29 }
   0xc   : > { %1261 = dma.hbm_to_vmem [thread:$0]  (!%p1619_p5), %s360_s11, 16, %s362_s30, [#allocation5]  }
   0xd   : > { %1267 = dma.hbm_to_vmem [thread:$0]  (!%p1619_p5), %s398_s16, 16, %s400_s22, [#allocation8]  }
   0xe   : > { %1258 = dma.hbm_to_vmem [thread:$0]  (!%p1619_p5), %s348_s19, 16, %s350_s24, [#allocation3]  }
   0xf   : > { %s384_s15 = sshll.u32 %s1508_s14, 4  ;;  %s412_s11 = sshll.u32 %s1776_s10, 4  ;;  %s385_s15 = int_to_ptr.vmem [resolvable:$true] %s384_s15  ;;  %s413_s11 = int_to_ptr.hbm [resolvable:$true] %s412_s11 }
  0x10   : > { %s1509_s30 = smov 64   ;;  %s1510_s16 = smov 4  }
  0x11   : > { %1264 = dma.hbm_to_vmem [thread:$0]  (!%p1619_p5), %s383_s29, 256, %s385_s15, [#allocation5], %s1509_s30, %s1509_s30, %s1510_s16  }
  0x12   : > { %s1511_s21 = smov [#allocation9]   ;;  %440 = sbr.rel (%p1605_p3) target bundleno = 2026 (0x7ea), region = 72 }
  0x13   : > { %s414_s22 = sshll.u32 %s1511_s21, 4  ;;  %s415_s22 = int_to_ptr.vmem [resolvable:$true] %s414_s22 }
  0x14   : > { %1270 = dma.hbm_to_vmem [thread:$0]  (!%p1619_p5), %s413_s11, 16, %s415_s22, [#allocation8]  }
  0x17   : > { %1490 = dma.done.wait (%p1271_p2), [#allocation3], 16  }
  0x18   : > { %1492 = vsyncadd (%p1271_p2), [#allocation3], 4294967280 }
  0x19   : > { %1494 = dma.done.wait (%p1271_p2), [#allocation5], 272  }
  0x1a   : > { %1496 = vsyncadd (%p1271_p2), [#allocation5], 4294967024 }
  0x1b   : > { %1498 = dma.done.wait (%p1271_p2), [#allocation8], 32  }
  0x1c   : > { %1500 = vsyncadd (%p1271_p2), [#allocation8], 4294967264  ;;  %p503_p6 = scmp.lt.s32.totalorder %s1600_s12, 1  ;;  %vm515_vm0 = vcmask 261120   ;;  %v1512_v2 = vmov 32.0   ;;  %v1226_v14 = vld [vmem:[%s1769_s3 + $0x8] sm:$0xff] }
  0x1d   : > { %1311 = vrcp.f32 %v1512_v2  ;;  %579 = vmatpush.bf16.msra.mxu0 %v1226_v14  ;;  %v1225_v15 = vld [vmem:[%s1769_s3] sm:$0xff]  ;;  %s1513_s14 = smov 104   ;;  %s1514_s15 = smov 120   ;;  %vm605_vm5 = vcmask 64512   ;;  %vm750_vm6 = vcmask 1043456   ;;  %vm843_vm7 = vcmask 130048  }
  0x1e   : > { %s1783_s12 = smov (!%p503_p6, %s1600_s12), 1  ;;  %v1305_v25 = vld [vmem:[#allocation2] ss:$0 sm:$0xff]  ;;  %v1306_v28 = vld [vmem:[#allocation4] ss:$0 sm:$0xff]  ;;  %s1515_s17 = smov 112  }
  0x1f   : > { %s1168_s28 = sshll.u32 %s1783_s12, 3  ;;  %s1516_s18 = smov 96   ;;  %vm845_vm8 = vcmask 195584  }
  0x20   : > { %s506_s23 = scalar_lea.vmem %s1766_s0, %s1168_s28  ;;  %s1517_s11 = smov 64  }
  0x21   : > { %v1663_v0 = vld [vmem:[%s506_s23] sm:$0xff]  ;;  %580 = vmatpush.bf16.msra.mxu0 %v1225_v15  ;;  %s1518_s30 = smov 8   ;;  %s1519_s16 = smov 24  }
  0x22   : > { %v516_v1 = vsel %vm515_vm0, %v1663_v0, 0.0  ;;  %s1520_s21 = smov 16   ;;  %s510_s20 = scalar_lea.vmem %s1779_s13, %s1168_s28 }
  0x23   : > { %517 = vadd.xlane.f32.xlu0 %v516_v1  ;;  %v1312_v3 = vpop.eup %1311 }
  0x24   : > { %v520_v4 = vmul.f32 32.0, %v1312_v3  ;;  %vm524_vm1 = vweird.f32 %v1312_v3 }
  0x26   : > { %v521_v5 = vsub.f32 1.0, %v520_v4 }
  0x28   : > { %v522_v6 = vmul.f32 %v1312_v3, %v521_v5 }
  0x2a   : > { %v523_v7 = vadd.f32 %v1312_v3, %v522_v6 }
  0x2c   : > { %v1667_v8 = vsel %vm524_vm1, %v1312_v3, %v523_v7  ;;  %vm1031_vm1 = vcmask 523264  }
  0x96   : > { %v518_v9 = vpop.xlane.xlu0 %517 }
  0x97   : > { %v526_v10 = vmul.f32 %v1667_v8, %v518_v9 }
  0x99   : > { %v527_v11 = vsub.f32 %v1663_v0, %v526_v10 }
  0x9b   : > { %v528_v12 = vmul.f32 %v527_v11, %v527_v11 }
  0x9d   : > { %v529_v13 = vsel %vm515_vm0, %v528_v12, 0.0 }
  0x9e   : > { %530 = vadd.xlane.f32.xlu0 %v529_v13 }
 0x111   : > { %v531_v16 = vpop.xlane.xlu0 %530 }
 0x112   : > { %v532_v17 = vmul.f32 %v531_v16, %v1667_v8 }
 0x114   : > { %v533_v18 = vadd.f32 1e-05, %v532_v17 }
 0x116   : > { %1313 = vrsqrt.f32 %v533_v18  ;;  %vm540_vm3 = vweird.f32 %v533_v18 }
 0x11c   : > { %v1314_v19 = vpop.eup %1313 }
 0x11d   : > { %v535_v20 = vmul.f32 %v1314_v19, %v533_v18  ;;  %vm541_vm2 = vweird.f32 %v1314_v19 }
 0x11e   : > { %vm542_vm4 = vmor %vm540_vm3, %vm541_vm2 }
 0x11f   : > { %v536_v21 = vmul.f32 %v1314_v19, %v535_v20 }
 0x121   : > { %v537_v22 = vmul.f32 0.5, %v536_v21 }
 0x123   : > { %v538_v23 = vsub.f32 1.5, %v537_v22 }
 0x125   : > { %v539_v24 = vmul.f32 %v1314_v19, %v538_v23 }
 0x127   : > { %v543_v26 = vsel %vm542_vm4, %v1314_v19, %v539_v24 }
 0x128   : > { %v544_v27 = vmul.f32 %v543_v26, %v527_v11 }
 0x12a   : > { %v548_v29 = vmul.f32 %v1305_v25, %v544_v27 }
 0x12c   : > { %v552_v30 = vadd.f32 %v1306_v28, %v548_v29 }
 0x12e   : > { %v553_v31 = vpack.c.bf16 %v552_v30, %v552_v30 }
 0x130   : > { %1178 = vmatmul.msk.bf16.vlgmr.msra.gmra.mxu0 %vm515_vm0, %v553_v31 }
 0x1ad   : > { %v582_v32 = vpop.f32.mrf.mxu0 }
 0x1ae   : > { %593 = vrot.lane.b32.xlu2 %v582_v32, %s1513_s14  ;;  %587 = vrot.lane.b32.xlu1 %v582_v32, %s1514_s15  ;;  %v596_v41 = vpack.c.bf16 %v582_v32, %v582_v32 }
 0x1b0   : > { %v601_v45 = vunpack.c.l.b16 %v596_v41 }
 0x1b2   : > { %v1685_v48 = vpack.c.b16 %v601_v45, %v601_v45 }
 0x1b5   : > { %v584_v33 = vpop.f32.mrf.mxu0 }
 0x1b6   : > { %590 = vrot.lane.b32.xlu1 %v582_v32, %s1515_s17 }
 0x208   : > { %v594_v34 = vpop.permute.xlu2 %593 }
 0x209   : > { %v599_v35 = vpack.c.bf16 %v594_v34, %v594_v34 }
 0x20b   : > { %v674_v36 = vunpack.c.l.b16 %v599_v35 }
 0x20d   : > { %v1680_v37 = vpack.c.b16 %v674_v36, %v674_v36 }
 0x20f   : > { %676 = vrot.lane.b32.xlu1 %v1680_v37, %s1516_s18 }
 0x220   : > { %v588_v38 = vpop.permute.xlu1 %587 }
 0x221   : > { %v597_v39 = vpack.c.bf16 %v588_v38, %v588_v38 }
 0x223   : > { %v626_v40 = vunpack.c.l.b16 %v597_v39 }
 0x225   : > { %v627_v42 = vpack.c.b16 %v626_v40, %v626_v40 }
 0x227   : > { %628 = vrot.lane.b32.xlu2 %v627_v42, %s1516_s18 }
 0x228   : > { %v591_v43 = vpop.permute.xlu1 %590 }
 0x229   : > { %v598_v44 = vpack.c.bf16 %v591_v43, %v591_v43 }
 0x22b   : > { %v650_v46 = vunpack.c.l.b16 %v598_v44 }
 0x22d   : > { %v1683_v47 = vpack.c.b16 %v650_v46, %v650_v46 }
 0x22f   : > { %652 = vrot.lane.b32.xlu0 %v1683_v47, %s1516_s18  ;;  %603 = vrot.lane.b32.xlu2 %v1685_v48, %s1516_s18 }
 0x281   : > { %v629_v49 = vpop.permute.xlu2 %628  ;;  %v677_v50 = vpop.permute.xlu1 %676 }
 0x282   : > { %v634_v51 = vsel %vm605_vm5, %v629_v49, 0  ;;  %v682_v52 = vsel %vm605_vm5, %v677_v50, 0 }
 0x283   : > { %643 = vmatpush.bf16.xpose.msra.mxu2 %v634_v51  ;;  %691 = vmatpush.bf16.xpose.msrb.mxu0 %v682_v52 }
 0x289   : > { %v604_v53 = vpop.permute.xlu2 %603 }
 0x28a   : > { %1180 = vmatmul.msk.bf16.vlgmr.msra.gmra.mxu2 %vm605_vm5, %v597_v39  ;;  %1182 = vmatmul.msk.bf16.vlgmr.msrb.gmra.mxu0 %vm605_vm5, %v599_v35  ;;  %v610_v54 = vsel %vm605_vm5, %v604_v53, 0 }
 0x28b   : > { %619 = vmatpush.bf16.xpose.msra.mxu1 %v610_v54 }
 0x292   : > { %1179 = vmatmul.msk.bf16.vlgmr.msra.gmra.mxu1 %vm605_vm5, %v596_v41 }
 0x2a1   : > { %v653_v55 = vpop.permute.xlu0 %652 }
 0x2a2   : > { %v658_v56 = vsel %vm605_vm5, %v653_v55, 0 }
 0x2a3   : > { %667 = vmatpush.bf16.xpose.msra.mxu3 %v658_v56 }
 0x2aa   : > { %1181 = vmatmul.msk.bf16.vlgmr.msra.gmra.mxu3 %vm605_vm5, %v598_v44 }
 0x307   : > { %v693_v57 = vpop.f32.mrf.mxu0 }
 0x308   : > { %v706_v58 = vsel %vm605_vm5, %v693_v57, -inf }
 0x309   : > { %707 = vmax.xlane.f32.xlu0 %v706_v58 }
 0x30d   : > { %v645_v59 = vpop.f32.mrf.mxu2 }
 0x30e   : > { %v700_v60 = vsel %vm605_vm5, %v645_v59, -inf }
 0x30f   : > { %701 = vmax.xlane.f32.xlu1 %v700_v60  ;;  %v621_v61 = vpop.f32.mrf.mxu1  ;;  %v695_v62 = vpop.f32.mrf.mxu0  ;;  %v1227_v60 = vld [vmem:[%s1770_s4] sm:$0xff] }
 0x310   : > { %v697_v5 = vsel %vm605_vm5, %v621_v61, -inf }
 0x315   : > { %v647_v63 = vpop.f32.mrf.mxu2 }
 0x317   : > { %v623_v1 = vpop.f32.mrf.mxu1 }
 0x31d   : > { %767 = vrot.lane.b32.xlu0 %v627_v42, %s1517_s11 }
 0x32d   : > { %v669_v2 = vpop.f32.mrf.mxu3 }
 0x32e   : > { %v703_v3 = vsel %vm605_vm5, %v669_v2, -inf }
 0x32f   : > { %704 = vmax.xlane.f32.xlu2 %v703_v3 }
 0x335   : > { %v671_v4 = vpop.f32.mrf.mxu3 }
 0x337   : > { %698 = vmax.xlane.f32.xlu2 %v697_v5 }
 0x37c   : > { %v708_v6 = vpop.xlane.xlu0 %707 }
 0x37d   : > { %v712_v7 = vsub.f32 %v693_v57, %v708_v6 }
 0x37f   : > { %v719_v9 = vmul.f32 1.442695, %v712_v7 }
 0x381   : > { %1315 = vpow2.f32 %v719_v9 }
 0x382   : > { %v702_v10 = vpop.xlane.xlu1 %701 }
 0x383   : > { %v710_v11 = vsub.f32 %v645_v59, %v702_v10  ;;  %v1228_v59 = vld [vmem:[%s1770_s4 + $0x8] sm:$0xff] }
 0x385   : > { %v715_v12 = vmul.f32 1.442695, %v710_v11 }
 0x387   : > { %v1316_v13 = vpop.eup %1315  ;;  %1317 = vpow2.f32 %v715_v12 }
 0x388   : > { %v730_v14 = vsel %vm605_vm5, %v1316_v13, 0.0 }
 0x389   : > { %731 = vadd.xlane.f32.xlu1 %v730_v14 }
 0x38d   : > { %v1318_v15 = vpop.eup %1317 }
 0x38e   : > { %v724_v17 = vsel %vm605_vm5, %v1318_v15, 0.0 }
 0x38f   : > { %v768_v16 = vpop.permute.xlu0 %767 }
 0x390   : > { %v773_v18 = vsel %vm750_vm6, %v768_v16, 0  ;;  %v1229_v16 = vld [vmem:[#allocation6] sm:$0xff] }
 0x391   : > { %725 = vadd.xlane.f32.xlu1 %v724_v17  ;;  %782 = vmatpush.bf16.msrb.mxu2 %v773_v18 }
 0x3a2   : > { %v705_v19 = vpop.xlane.xlu2 %704 }
 0x3a3   : > { %v711_v20 = vsub.f32 %v669_v2, %v705_v19 }
 0x3a5   : > { %v717_v21 = vmul.f32 1.442695, %v711_v20 }
 0x3a7   : > { %1319 = vpow2.f32 %v717_v21 }
 0x3aa   : > { %v699_v22 = vpop.xlane.xlu2 %698  ;;  %809 = vrot.lane.b32.xlu1 %v1680_v37, %s1517_s11 }
 0x3ab   : > { %v709_v23 = vsub.f32 %v621_v61, %v699_v22 }
 0x3ad   : > { %v1320_v24 = vpop.eup %1319  ;;  %v713_v25 = vmul.f32 1.442695, %v709_v23 }
 0x3ae   : > { %v727_v26 = vsel %vm605_vm5, %v1320_v24, 0.0 }
 0x3af   : > { %1321 = vpow2.f32 %v713_v25  ;;  %728 = vadd.xlane.f32.xlu2 %v727_v26  ;;  %v1307_v25 = vld [vmem:[%s1771_s5] ss:$0 sm:$0xff] }
 0x3b5   : > { %v1322_v27 = vpop.eup %1321 }
 0x3b6   : > { %v721_v28 = vsel %vm605_vm5, %v1322_v27, 0.0 }
 0x3b7   : > { %722 = vadd.xlane.f32.xlu0 %v721_v28 }
 0x3c7   : > { %788 = vrot.lane.b32.xlu2 %v1683_v47, %s1517_s11 }
 0x3cf   : > { %745 = vrot.lane.b32.xlu2 %v1685_v48, %s1517_s11 }
 0x3fc   : > { %v732_v29 = vpop.xlane.xlu1 %731 }
 0x404   : > { %v726_v30 = vpop.xlane.xlu1 %725 }
 0x405   : > { %1323 = vrcp.f32 %v726_v30 }
 0x406   : > { %1325 = vrcp.f32 %v732_v29 }
 0x40b   : > { %v1324_v31 = vpop.eup %1323 }
 0x40c   : > { %v738_v32 = vmul.f32 %v1324_v31, %v1318_v15  ;;  %v1326_v34 = vpop.eup %1325  ;;  %v1230_v15 = vld [vmem:[#allocation6 + $0x8] sm:$0xff]  ;;  %v1309_v31 = vld [vmem:[#allocation7] ss:$0 sm:$0xff] }
 0x40d   : > { %v740_v35 = vmul.f32 %v1326_v34, %v1316_v13  ;;  %943 = vmatpush.bf16.msra.mxu2 %v1230_v15 }
 0x40e   : > { %v742_v33 = vpack.c.bf16 %v738_v32, %v738_v32 }
 0x40f   : > { %v744_v38 = vpack.c.bf16 %v740_v35, %v740_v35 }
 0x410   : > { %1184 = vmatmul.msk.bf16.vlgmr.msrb.gmra.mxu2 %vm605_vm5, %v742_v33 }
 0x411   : > { %944 = vmatpush.bf16.msra.mxu2 %v1229_v16 }
 0x41c   : > { %v810_v36 = vpop.permute.xlu1 %809 }
 0x41d   : > { %v815_v37 = vsel %vm750_vm6, %v810_v36, 0 }
 0x41e   : > { %824 = vmatpush.bf16.msra.mxu0 %v815_v37 }
 0x421   : > { %1186 = vmatmul.msk.bf16.vlgmr.msra.gmra.mxu0 %vm605_vm5, %v744_v38  ;;  %v1234_v38 = vld [vmem:[%s1775_s9 + $0x18] sm:$0xff] }
 0x422   : > { %v729_v39 = vpop.xlane.xlu2 %728 }
 0x423   : > { %1327 = vrcp.f32 %v729_v39 }
 0x429   : > { %v1328_v40 = vpop.eup %1327 }
 0x42a   : > { %v739_v41 = vmul.f32 %v1328_v40, %v1320_v24  ;;  %v789_v42 = vpop.permute.xlu2 %788  ;;  %v723_v43 = vpop.xlane.xlu0 %722 }
 0x42b   : > { %1329 = vrcp.f32 %v723_v43  ;;  %v794_v44 = vsel %vm750_vm6, %v789_v42, 0  ;;  %v1233_v43 = vld [vmem:[%s1775_s9 + $0x10] sm:$0xff] }
 0x42c   : > { %803 = vmatpush.bf16.msrb.mxu3 %v794_v44  ;;  %v743_v45 = vpack.c.bf16 %v739_v41, %v739_v41 }
 0x42f   : > { %1185 = vmatmul.msk.bf16.vlgmr.msrb.gmra.mxu3 %vm605_vm5, %v743_v45 }
 0x430   : > { %1039 = vmatpush.bf16.msra.mxu3 %v1234_v38 }
 0x431   : > { %v1330_v46 = vpop.eup %1329 }
 0x432   : > { %v737_v47 = vmul.f32 %v1330_v46, %v1322_v27  ;;  %v746_v48 = vpop.permute.xlu2 %745 }
 0x433   : > { %v752_v49 = vsel %vm750_vm6, %v746_v48, 0  ;;  %v1232_v48 = vld [vmem:[%s1775_s9 + $0x8] sm:$0xff] }
 0x434   : > { %v741_v50 = vpack.c.bf16 %v737_v47, %v737_v47  ;;  %761 = vmatpush.bf16.msrb.mxu1 %v752_v49  ;;  %1040 = vmatpush.bf16.msra.mxu3 %v1233_v43 }
 0x437   : > { %1183 = vmatmul.msk.bf16.vlgmr.msrb.gmra.mxu1 %vm605_vm5, %v741_v50 }
 0x438   : > { %873 = vmatpush.bf16.msra.mxu1 %v1228_v59  ;;  %1041 = vmatpush.bf16.msra.mxu3 %v1232_v48 }
 0x43c   : > { %874 = vmatpush.bf16.msra.mxu1 %v1227_v60 }
 0x493   : > { %v784_v51 = vpop.f32.mrf.mxu2 }
 0x494   : > { %831 = vrot.lane.b32.xlu1 %v784_v51, %s1518_s30 }
 0x49b   : > { %v786_v52 = vpop.f32.mrf.mxu2 }
 0x49c   : > { %v1231_v52 = vld [vmem:[%s1775_s9] sm:$0xff] }
 0x49d   : > { %1042 = vmatpush.bf16.msra.mxu3 %v1231_v52 }
 0x49e   : > { %v826_v53 = vpop.f32.mrf.mxu0 }
 0x49f   : > { %839 = vrot.lane.b32.xlu1 %v826_v53, %s1519_s16 }
 0x4a6   : > { %v828_v54 = vpop.f32.mrf.mxu0 }
 0x4b2   : > { %v805_v55 = vpop.f32.mrf.mxu3 }
 0x4b3   : > { %835 = vrot.lane.b32.xlu2 %v805_v55, %s1520_s21 }
 0x4b4   : > { %v763_v56 = vpop.f32.mrf.mxu1 }
 0x4ba   : > { %v807_v57 = vpop.f32.mrf.mxu3 }
 0x4bc   : > { %v765_v58 = vpop.f32.mrf.mxu1 }
 0x506   : > { %v832_v61 = vpop.permute.xlu1 %831 }
 0x507   : > { %v842_v63 = vsel %vm605_vm5, %v763_v56, %v832_v61 }
 0x50d   : > { %v836_v62 = vpop.permute.xlu2 %835 }
 0x50e   : > { %v844_v1 = vsel %vm843_vm7, %v842_v63, %v836_v62 }
 0x511   : > { %v840_v2 = vpop.permute.xlu1 %839 }
 0x512   : > { %v846_v3 = vsel %vm845_vm8, %v844_v1, %v840_v2 }
 0x513   : > { %v847_v4 = vpack.c.bf16 %v846_v3, %v846_v3 }
 0x515   : > { %1195 = vmatmul.msk.bf16.vlgmr.msra.gmra.mxu1 %vm515_vm0, %v847_v4 }
 0x592   : > { %v876_v5 = vpop.f32.mrf.mxu1 }
 0x593   : > { %v1729_v6 = vadd.f32 %v876_v5, %v1663_v0 }
 0x595   : > { %v883_v7 = vsel %vm515_vm0, %v1729_v6, 0.0 }
 0x596   : > { %884 = vadd.xlane.f32.xlu2 %v883_v7 }
 0x59a   : > { %v878_v9 = vpop.f32.mrf.mxu1 }
 0x609   : > { %v885_v10 = vpop.xlane.xlu2 %884 }
 0x60a   : > { %v886_v11 = vmul.f32 %v885_v10, %v1667_v8 }
 0x60c   : > { %v887_v12 = vsub.f32 %v1729_v6, %v886_v11 }
 0x60e   : > { %v888_v13 = vmul.f32 %v887_v12, %v887_v12 }
 0x610   : > { %v889_v14 = vsel %vm515_vm0, %v888_v13, 0.0 }
 0x611   : > { %890 = vadd.xlane.f32.xlu1 %v889_v14 }
 0x684   : > { %v891_v0 = vpop.xlane.xlu1 %890 }
 0x685   : > { %v892_v17 = vmul.f32 %v891_v0, %v1667_v8  ;;  %v1308_v8 = vld [vmem:[%s1772_s6] ss:$0 sm:$0xff] }
 0x687   : > { %v893_v18 = vadd.f32 1e-05, %v892_v17  ;;  %v1310_v17 = vld [vmem:[#allocation9] ss:$0 sm:$0xff] }
 0x689   : > { %1331 = vrsqrt.f32 %v893_v18  ;;  %vm900_vm10 = vweird.f32 %v893_v18 }
 0x68f   : > { %v1332_v19 = vpop.eup %1331 }
 0x690   : > { %v895_v20 = vmul.f32 %v1332_v19, %v893_v18  ;;  %vm901_vm9 = vweird.f32 %v1332_v19 }
 0x691   : > { %vm902_vm11 = vmor %vm900_vm10, %vm901_vm9 }
 0x692   : > { %v896_v21 = vmul.f32 %v1332_v19, %v895_v20 }
 0x694   : > { %v897_v22 = vmul.f32 0.5, %v896_v21 }
 0x696   : > { %v898_v23 = vsub.f32 1.5, %v897_v22 }
 0x698   : > { %v899_v24 = vmul.f32 %v1332_v19, %v898_v23 }
 0x69a   : > { %v903_v26 = vsel %vm902_vm11, %v1332_v19, %v899_v24 }
 0x69b   : > { %v904_v27 = vmul.f32 %v903_v26, %v887_v12 }
 0x69d   : > { %v908_v28 = vmul.f32 %v1307_v25, %v904_v27 }
 0x69f   : > { %v912_v29 = vadd.f32 %v1308_v8, %v908_v28 }
 0x6a1   : > { %v913_v30 = vpack.c.bf16 %v912_v29, %v912_v29 }
 0x6a3   : > { %1204 = vmatmul.msk.bf16.vlgmr.msra.gmra.mxu2 %vm515_vm0, %v913_v30 }
 0x726   : > { %v946_v32 = vpop.f32.mrf.mxu2 }
 0x727   : > { %v947_v33 = vadd.f32 %v1309_v31, %v946_v32 }
 0x729   : > { %v951_v34 = vmul.f32 0.70710677, %v947_v33  ;;  %v950_v14 = vmul.f32 0.5, %v947_v33 }
 0x72b   : > { %v952_v35 = vmul.f32 %v951_v34, %v951_v34 }
 0x72d   : > { %v953_v36 = vmin.f32 %v952_v35, 16.0 }
 0x72e   : > { %v948_v37 = vpop.f32.mrf.mxu2 }
 0x72f   : > { %v954_v39 = vmul.f32 2.1237322e-06, %v953_v36  ;;  %v965_v40 = vmul.f32 3.8918573e-05, %v953_v36 }
 0x731   : > { %v955_v41 = vadd.f32 0.00028619796, %v954_v39  ;;  %v966_v42 = vadd.f32 0.001143296, %v965_v40 }
 0x733   : > { %v956_v44 = vmul.f32 %v955_v41, %v953_v36  ;;  %v967_v45 = vmul.f32 %v966_v42, %v953_v36 }
 0x735   : > { %v968_v46 = vadd.f32 0.014752088, %v967_v45  ;;  %v957_v47 = vadd.f32 0.0036580483, %v956_v44 }
 0x737   : > { %v969_v49 = vmul.f32 %v968_v46, %v953_v36  ;;  %v958_v51 = vmul.f32 %v957_v47, %v953_v36 }
 0x739   : > { %v970_v50 = vadd.f32 0.112945676, %v969_v49  ;;  %v959_v55 = vadd.f32 0.05243302, %v958_v51 }
 0x73b   : > { %v971_v53 = vmul.f32 %v970_v50, %v953_v36  ;;  %v960_v58 = vmul.f32 %v959_v55, %v953_v36 }
 0x73d   : > { %v972_v54 = vadd.f32 0.4994258, %v971_v53  ;;  %v961_v59 = vadd.f32 0.18741608, %v960_v58 }
 0x73f   : > { %v973_v56 = vmul.f32 %v972_v54, %v953_v36  ;;  %v962_v61 = vmul.f32 %v961_v59, %v953_v36 }
 0x741   : > { %v974_v57 = vadd.f32 1.0, %v973_v56  ;;  %v963_v2 = vadd.f32 1.1283791, %v962_v61 }
 0x743   : > { %1333 = vrcp.f32 %v974_v57  ;;  %v986_v1 = vand.u32 2147483648, %v974_v57  ;;  %v984_v4 = vand.u32 2147483647, %v974_v57  ;;  %vm980_vm13 = vweird.f32 %v974_v57 }
 0x744   : > { %v964_v9 = vmul.f32 %v963_v2, %v951_v34 }
 0x745   : > { %v987_v7 = vor.u32 1.1754944e-38, %v986_v1  ;;  %vm985_vm15 = vcmp.eq.f32.partialorder %v984_v4, 8.507059e+37 }
 0x749   : > { %v1334_v60 = vpop.eup %1333 }
 0x74a   : > { %v976_v62 = vmul.f32 %v1334_v60, %v974_v57  ;;  %vm981_vm12 = vweird.f32 %v1334_v60 }
 0x74b   : > { %vm982_vm14 = vmor %vm980_vm13, %vm981_vm12 }
 0x74c   : > { %v977_v63 = vsub.f32 1.0, %v976_v62 }
 0x74e   : > { %v978_v3 = vmul.f32 %v1334_v60, %v977_v63 }
 0x750   : > { %v979_v5 = vadd.f32 %v1334_v60, %v978_v3 }
 0x752   : > { %v983_v10 = vsel %vm982_vm14, %v1334_v60, %v979_v5 }
 0x753   : > { %v988_v11 = vsel %vm985_vm15, %v987_v7, %v983_v10 }
 0x754   : > { %v989_v12 = vmul.f32 %v988_v11, %v964_v9 }
 0x756   : > { %v1205_v13 = vclamps-f32 %v989_v12, 1.0 }
 0x758   : > { %v992_v15 = vadd.f32 1.0, %v1205_v13 }
 0x75a   : > { %v993_v16 = vmul.f32 %v992_v15, %v950_v14 }
 0x75c   : > { %v994_v0 = vpack.c.bf16 %v993_v16, %v993_v16 }
 0x75e   : > { %1222 = vmatmul.msk.bf16.vlgmr.msra.gmra.mxu3 %vm1031_vm1, %v994_v0 }
 0x7e1   : > { %v1044_v18 = vpop.f32.mrf.mxu3 }
 0x7e2   : > { %v1045_v19 = vadd.f32 %v1310_v17, %v1044_v18 }
 0x7e4   : > { %v1048_v20 = vadd.f32 %v1045_v19, %v1729_v6 }
 0x7e6   : > { %1049 = vst.msk [vmem:[%s510_s20] sm:$0xff] %vm515_vm0, %v1048_v20 }
 0x7e9   : > { %v1046_v21 = vpop.f32.mrf.mxu3 }
 0x7ea PF: > { %s26_s25 = sadd.s32 1, %s1503_s25  }
 0x7eb   : > { %p23_p7 = scmp.ge.s32.totalorder %s26_s25, 4  }
 0x7ed   :  { %25 = sbr.rel (!%p23_p7) target bundleno = 3 (0x3), region = 123 }
 0x7f2   :  { %1069 = vsyncpa [#allocation3], 1 }
 0x7f3   :  { %1071 = vsyncpa [#allocation3 + $0x1], 1 }
 0x7f4   :  { %1072 = vsyncpa [#allocation5], 1 }
 0x7f5   :  { %1073 = vsyncpa [#allocation8], 1 }

</bundles_post_ra>
